<compile_context>
chip_gen: v5e
topology: v5e:2x2
jax: 0.10.0
libtpu: 0.0.40
codegen_flags: <defaults>
</compile_context>

<pallas_src>
import math
from functools import partial

import numpy as np
import jax
import jax.numpy as jnp
from jax.experimental import pallas as pl
from jax.experimental.pallas import tpu as pltpu

NEG_SLOPE = 0.1          # nn.LeakyReLU(0.1)
BN_EPS = 1e-5            # nn.BatchNorm2d eps
KSIZE = 7                # conv kernel size (2*3+1 from circle_filter_generator(..., 3))


# ----------------------------------------------------------------------------
# Circle filter: analytic closed form of the reference dblquad integral.
#   integral over [lb_x,ub_x]x[lb_y,ub_y] of (cos(t)*x + sin(t)*y) dx dy
# ----------------------------------------------------------------------------
def circle_filter_generator(in_channels, out_channels, kernel_size):
    size = 2 * kernel_size + 1
    filt = np.zeros((out_channels, in_channels, size, size), np.float64)
    for i in range(out_channels):
        theta = 2.0 * math.pi * (i / out_channels)
        ct, st = math.cos(theta), math.sin(theta)
        for n in range(size):
            lb_x = -1.0 + 2.0 * n / size
            ub_x = -1.0 + 2.0 * (n + 1) / size
            for m in range(size):
                lb_y = -1.0 + 2.0 * m / size
                ub_y = -1.0 + 2.0 * (m + 1) / size
                val = (ct * 0.5 * (ub_x ** 2 - lb_x ** 2) * (ub_y - lb_y)
                       + st * 0.5 * (ub_y ** 2 - lb_y ** 2) * (ub_x - lb_x))
                filt[i, :, n, m] = val
    return filt


# ----------------------------------------------------------------------------
# Parameters (deterministic; conv weight = exact circle filter).
# ----------------------------------------------------------------------------
def make_params(cin, cout, seed=0):
    keys = jax.random.split(jax.random.PRNGKey(seed), 8)
    w_oihw = circle_filter_generator(cin, cout, (KSIZE - 1) // 2)          # (cout,cin,7,7)
    conv_w = jnp.asarray(np.transpose(w_oihw, (2, 3, 1, 0)), jnp.float32)  # (kh,kw,ci,co)
    kb = 1.0 / math.sqrt(cin * KSIZE * KSIZE)
    conv_b = jax.random.uniform(keys[0], (cout,), jnp.float32, -kb, kb)
    # BatchNorm2d, inference (running-stats) semantics; mildly perturbed so the fold
    # is actually exercised.
    bn_gamma = 1.0 + 0.1 * jax.random.normal(keys[1], (cout,), jnp.float32)
    bn_beta = 0.1 * jax.random.normal(keys[2], (cout,), jnp.float32)
    bn_mean = 0.1 * jax.random.normal(keys[3], (cout,), jnp.float32)
    bn_var = jnp.abs(1.0 + 0.1 * jax.random.normal(keys[4], (cout,), jnp.float32))
    # TODO(synk): exact LPSLogitLayers architecture and the Gumbel-softmax training
    # path are not specified in the reference snippet; an equivalent eval-mode
    # (hard argmax) logit net [circular 3x3 conv C->C + LeakyReLU -> global mean ->
    # linear] with synthetic weights is used instead.
    lps_wl = jax.random.normal(keys[5], (3, 3, cout, cout), jnp.float32) / math.sqrt(9.0 * cout)
    lps_bl = 0.01 * jax.random.normal(keys[6], (cout,), jnp.float32)
    lps_wp = jax.random.normal(keys[7], (cout,), jnp.float32) / math.sqrt(cout)
    return {"conv_w": conv_w, "conv_b": conv_b,
            "bn_gamma": bn_gamma, "bn_beta": bn_beta,
            "bn_mean": bn_mean, "bn_var": bn_var,
            "lps_wl": lps_wl, "lps_bl": lps_bl, "lps_wp": lps_wp}


# ----------------------------------------------------------------------------
# Packing: BN fold + kh/kw/pj-folded Toeplitz conv weight (512 x 256) and a
# pj-block-diagonal Toeplitz logit-conv weight (3 x 256 x 256), all 128-padded.
# ----------------------------------------------------------------------------
def pack_params(params, cin, cout, h):
    K = KSIZE
    HO = (h - 4) // 2                 # polyphase output spatial size (e.g. 6)
    HP = (h + 2) // 2                 # padded-input polyphase spatial size (e.g. 9)
    W2 = 2 * HP * cin                 # one row-window slab width (e.g. 72)
    OW = HO * cout                    # valid lanes of one pj component (e.g. 96)
    OWP = ((OW + 127) // 128) * 128   # lane-padded component width (e.g. 128)
    KW = K * W2                       # folded contraction length (e.g. 504)
    KWP = ((KW + 127) // 128) * 128   # padded contraction length (e.g. 512)

    w = np.asarray(params["conv_w"], np.float32)             # (K,K,ci,co)
    bias = np.asarray(params["conv_b"], np.float32)
    gamma = np.asarray(params["bn_gamma"], np.float32)
    beta = np.asarray(params["bn_beta"], np.float32)
    rmean = np.asarray(params["bn_mean"], np.float32)
    rvar = np.asarray(params["bn_var"], np.float32)

    scale = gamma / np.sqrt(rvar + BN_EPS)                    # BN folded (inference)
    shift = beta + scale * (bias - rmean)                     # includes conv bias
    wfold = w * scale[None, None, None, :]

    # Conv weight: rows = (kh, qj, cw, ci) folded contraction; cols = (pj, c, co).
    wc = np.zeros((KWP, 2 * OWP), np.float32)
    for pj in range(2):
        for kh in range(K):
            for kw in range(K):
                qj = (pj + kw) % 2
                b = (pj + kw) // 2
                for c in range(HO):
                    r0 = kh * W2 + qj * HP * cin + (c + b) * cin
                    c0 = pj * OWP + c * cout
                    wc[r0:r0 + cin, c0:c0 + cout] += wfold[kh, kw]

    # LPS logit-net circular 3x3 conv (Cout->Cout), width-Toeplitz, block-diag over pj.
    wl = np.asarray(params["lps_wl"], np.float32)             # (3,3,ci,ko)
    wl_pad = np.zeros((3, OWP, OWP), np.float32)
    for dh in range(3):
        for c in range(HO):
            for dw in range(3):
                cc = (c + dw - 1) % HO                        # circular column wrap
                wl_pad[dh, cc * cout:(cc + 1) * cout, c * cout:(c + 1) * cout] += wl[dh, dw]
    wl_blk = np.zeros((3, 2 * OWP, 2 * OWP), np.float32)
    wl_blk[:, :OWP, :OWP] = wl_pad
    wl_blk[:, OWP:, OWP:] = wl_pad

    def tile_pad(v):                                          # (cout,) -> (1, 2*OWP)
        t = np.zeros((2 * OWP,), np.float32)
        tt = np.tile(v, HO)
        t[:OW] = tt
        t[OWP:OWP + OW] = tt
        return t[None, :]

    shift_t = tile_pad(shift)
    bl_t = tile_pad(np.asarray(params["lps_bl"], np.float32))
    wp_t = tile_pad(np.asarray(params["lps_wp"], np.float32) / float(HO * HO))

    return {"wc": jnp.asarray(wc, jnp.bfloat16),
            "wl": jnp.asarray(wl_blk, jnp.bfloat16),
            "shift_t": jnp.asarray(shift_t, jnp.float32),
            "bl_t": jnp.asarray(bl_t, jnp.float32),
            "wp_t": jnp.asarray(wp_t, jnp.float32)}


# ----------------------------------------------------------------------------
# Wrapper: NCHW boundary, circular pad, row-window repack (kh/pi fold with the
# logit-conv row wrap baked in), pallas_call, unpack.
# ----------------------------------------------------------------------------
def circle_filters_forward(x_nchw, packed, *, cout, block_samples=None):
    N, CIN, H, W = x_nchw.shape
    K = KSIZE
    HO = (H - 4) // 2
    HP = (H + 2) // 2
    HE = HO + 2                    # component rows + 2 circular-wrap rows (e.g. 8)
    W2 = 2 * HP * CIN
    KWP = packed["wc"].shape[0]    # padded contraction length (e.g. 512)
    OWP = packed["wc"].shape[1] // 2
    OW = HO * cout

    B = block_samples if block_samples is not None else max(1, min(8, N // 2))
    G = -(-N // B)                 # grid steps (>= 2 for N >= 2 with the default B)
    NP = G * B
    M = B * 2 * HE                 # matmul rows per grid step (e.g. 16 for B=1)

    # ---- circular pad + polyphase column split -------------------------------
    x = jnp.transpose(x_nchw, (0, 2, 3, 1)).astype(jnp.float32)        # NHWC
    xpad = jnp.pad(x, ((0, 0), (1, 1), (1, 1), (0, 0)), mode="wrap")   # (N,H+2,W+2,C)
    c0 = xpad[:, :, 0::2, :].reshape(N, H + 2, HP * CIN)
    c1 = xpad[:, :, 1::2, :].reshape(N, H + 2, HP * CIN)
    xrow = jnp.concatenate([c0, c1], axis=-1)                          # (N,H+2,W2)

    # ---- row-window gather: U[pi, i_ext, kh] = conv-row window index ----------
    # i_ext = 0 and HE-1 duplicate the circularly-wrapped component rows so the
    # LPS logit 3x3 conv needs no roll/concatenate in-kernel.
    U = np.zeros((2, HE, K), np.int32)
    for pi in range(2):
        for ie in range(HE):
            r = pi + 2 * ((ie - 1) % HO)
            for kh in range(K):
                U[pi, ie, kh] = r + kh
    lhs = xrow[:, U, :]                                 # (N, 2, HE, K, W2)
    lhs = lhs.reshape(N, 2 * HE, K * W2)
    lhs = jnp.pad(lhs, ((0, NP - N), (0, 0), (0, KWP - K * W2)))
    lhs = lhs.reshape(NP * 2 * HE, KWP).astype(jnp.bfloat16)           # bf16 in wrapper

    # ---- fused kernel ---------------------------------------------------------
    def kernel(lhs_ref, wc_ref, shift_ref, wl_ref, bl_ref, wp_ref, o_ref):
        f32 = jnp.float32
        # One MXU matmul: conv7x7(circular) for all B samples, both pi, both pj.
        acc = jnp.dot(lhs_ref[...], wc_ref[...], preferred_element_type=f32)  # (M, 2*OWP)
        y = acc + shift_ref[...]                       # folded BN + conv bias
        y = jnp.where(y >= 0.0, y, NEG_SLOPE * y)      # LeakyReLU(0.1), f32 epilogue
        yb = y.astype(jnp.bfloat16)

        # LPS logit 3x3 conv, batched over samples/pi/pj (block-diag weight).
        z0 = jnp.dot(yb, wl_ref[0], preferred_element_type=f32)
        z1 = jnp.dot(yb, wl_ref[1], preferred_element_type=f32)
        z2 = jnp.dot(yb, wl_ref[2], preferred_element_type=f32)

        for s in range(B):
            logits, comps = [], []
            for pi in range(2):
                r = (2 * s + pi) * HE
                h = (z0[r:r + HO, :] + z1[r + 1:r + 1 + HO, :]
                     + z2[r + 2:r + 2 + HO, :]) + bl_ref[...]
                h = jnp.where(h >= 0.0, h, NEG_SLOPE * h)
                t = h * wp_ref[...]                    # global-mean/linear folded in
                for pj in range(2):
                    logits.append(jnp.sum(t[:, pj * OWP:(pj + 1) * OWP], keepdims=True))
                    comps.append(y[r:r + HE, pj * OWP:(pj + 1) * OWP])   # (HE, OWP)

            # hard (eval-mode) argmax selection; >= chain = first-index tie-break.
            l0, l1, l2, l3 = logits
            s0 = (l0 >= l1) & (l0 >= l2) & (l0 >= l3)
            s1 = jnp.logical_not(s0) & (l1 >= l2) & (l1 >= l3)
            s2 = jnp.logical_not(s0) & jnp.logical_not(s1) & (l2 >= l3)
            s3 = jnp.logical_not(s0 | s1 | s2)
            sel = (comps[0] * s0.astype(f32) + comps[1] * s1.astype(f32)
                   + comps[2] * s2.astype(f32) + comps[3] * s3.astype(f32))
            o_ref[s * HE:(s + 1) * HE, :] = sel.astype(o_ref.dtype)

    flops = G * (2 * M * KWP * (2 * OWP) + 3 * 2 * M * (2 * OWP) * (2 * OWP))
    bytes_accessed = (lhs.size * 2 + packed["wc"].size * 2 + packed["wl"].size * 2
                      + 3 * 2 * OWP * 4 + NP * HE * OWP * 4)

    out2 = pl.pallas_call(
        kernel,
        out_shape=jax.ShapeDtypeStruct((NP * HE, OWP), jnp.float32),
        grid_spec=pltpu.PrefetchScalarGridSpec(
            num_scalar_prefetch=0,
            grid=(G,),
            in_specs=[
                pl.BlockSpec((M, KWP), lambda n: (n, 0)),
                pl.BlockSpec((KWP, 2 * OWP), lambda n: (0, 0)),
                pl.BlockSpec((1, 2 * OWP), lambda n: (0, 0)),
                pl.BlockSpec((3, 2 * OWP, 2 * OWP), lambda n: (0, 0, 0)),
                pl.BlockSpec((1, 2 * OWP), lambda n: (0, 0)),
                pl.BlockSpec((1, 2 * OWP), lambda n: (0, 0)),
            ],
            out_specs=pl.BlockSpec((B * HE, OWP), lambda n: (n, 0)),
        ),
        compiler_params=pltpu.CompilerParams(
            dimension_semantics=("parallel",),
            vmem_limit_bytes=32 * 1024 * 1024,
        ),
        cost_estimate=pl.CostEstimate(flops=flops, transcendentals=0,
                                      bytes_accessed=bytes_accessed),
    )(lhs, packed["wc"], packed["shift_t"], packed["wl"],
      packed["bl_t"], packed["wp_t"])

    y_out = out2.reshape(NP, HE, OWP)[:N, 1:1 + HO, :OW]      # drop wrap rows / pad lanes
    y_out = y_out.reshape(N, HO, HO, cout)
    return jnp.transpose(y_out, (0, 3, 1, 2))                 # NCHW


# ----------------------------------------------------------------------------
# Pure-JAX f32 reference of conv + BN(inference) + LeakyReLU, as the 4 polyphase
# components (selection-index-agnostic correctness check).
# ----------------------------------------------------------------------------
def reference_conv_components(x_nchw, params):
    x = jnp.transpose(x_nchw, (0, 2, 3, 1)).astype(jnp.float32)
    xpad = jnp.pad(x, ((0, 0), (1, 1), (1, 1), (0, 0)), mode="wrap")
    y = jax.lax.conv_general_dilated(
        xpad, params["conv_w"], window_strides=(1, 1), padding="VALID",
        dimension_numbers=("NHWC", "HWIO", "NHWC"),
        precision=jax.lax.Precision.HIGHEST)
    y = y + params["conv_b"]
    scale = params["bn_gamma"] / jnp.sqrt(params["bn_var"] + BN_EPS)
    y = scale * (y - params["bn_mean"]) + params["bn_beta"]
    y = jnp.where(y >= 0.0, y, NEG_SLOPE * y)
    return jnp.stack([y[:, pi::2, pj::2, :] for pi in (0, 1) for pj in (0, 1)], axis=1)


if __name__ == "__main__":
    N, CIN, COUT, H, W = 2, 4, 16, 16, 16
    key = jax.random.PRNGKey(0)
    x = jax.random.normal(key, (N, CIN, H, W), jnp.float32)            # NCHW like PyTorch

    params = make_params(CIN, COUT, seed=0)
    packed = pack_params(params, CIN, COUT, H)

    fwd = jax.jit(partial(circle_filters_forward, cout=COUT))
    out = jax.block_until_ready(fwd(x, packed))

    HO = (H - 4) // 2
    assert out.shape == (N, COUT, HO, HO), out.shape
    assert bool(jnp.all(jnp.isfinite(out)))

    # The fused kernel's output must match (up to bf16 MXU noise) one of the four
    # reference polyphase components of conv+BN+LeakyReLU; the particular index is
    # chosen by the (synthetic, eval-mode) LPS logit network.
    comps = reference_conv_components(x, params)                       # (N,4,HO,HO,C)
    out_nhwc = jnp.transpose(out, (0, 2, 3, 1))                        # (N,HO,HO,C)
    err = jnp.min(jnp.max(jnp.abs(comps - out_nhwc[:, None]), axis=(2, 3, 4)), axis=1)
    assert bool(jnp.all(err < 0.1)), err

    print("KERNEL_OK")
</pallas_src>

<mosaic_0001>
module attributes {stable_mosaic.version = 11 : i64} {
  func.func @kernel(%arg0: i32, %arg1: memref<16x512xbf16, #tpu.memory_space<vmem>>, %arg2: memref<512x256xbf16, #tpu.memory_space<vmem>>, %arg3: memref<1x256xf32, #tpu.memory_space<vmem>>, %arg4: memref<3x256x256xbf16, #tpu.memory_space<vmem>>, %arg5: memref<1x256xf32, #tpu.memory_space<vmem>>, %arg6: memref<1x256xf32, #tpu.memory_space<vmem>>, %arg7: memref<8x128xf32, #tpu.memory_space<vmem>>) attributes {dimension_semantics = [#tpu.dimension_semantics<parallel>], iteration_bounds = array<i64: 2>, scalar_prefetch = 0 : i64, scratch_operands = 0 : i64, tpu.core_type = #tpu.core_type<tc>, window_params = [{transform_indices = @transform_0, window_bounds = array<i64: 16, 512>}, {pipeline_mode = #tpu.pipeline_mode<synchronous>, transform_indices = @transform_1, window_bounds = array<i64: 512, 256>}, {pipeline_mode = #tpu.pipeline_mode<synchronous>, transform_indices = @transform_2, window_bounds = array<i64: 1, 256>}, {pipeline_mode = #tpu.pipeline_mode<synchronous>, transform_indices = @transform_3, window_bounds = array<i64: 3, 256, 256>}, {pipeline_mode = #tpu.pipeline_mode<synchronous>, transform_indices = @transform_4, window_bounds = array<i64: 1, 256>}, {pipeline_mode = #tpu.pipeline_mode<synchronous>, transform_indices = @transform_5, window_bounds = array<i64: 1, 256>}, {transform_indices = @transform_6, window_bounds = array<i64: 8, 128>}]} {
    %c0 = arith.constant 0 : index
    %c0_0 = arith.constant 0 : index
    %0 = vector.load %arg1[%c0, %c0_0] : memref<16x512xbf16, #tpu.memory_space<vmem>>, vector<16x512xbf16>
    %c0_1 = arith.constant 0 : index
    %c0_2 = arith.constant 0 : index
    %1 = vector.load %arg2[%c0_1, %c0_2] : memref<512x256xbf16, #tpu.memory_space<vmem>>, vector<512x256xbf16>
    %cst = arith.constant dense<0.000000e+00> : vector<16x256xf32>
    %2 = tpu.matmul %0, %1, %cst {dimension_numbers = #tpu.dot_dimension_numbers<[1], [0], [0], [1], [0, 0, 1, 1], [], []>} : vector<16x512xbf16>, vector<512x256xbf16>, vector<16x256xf32> -> vector<16x256xf32>
    %c0_3 = arith.constant 0 : index
    %c0_4 = arith.constant 0 : index
    %3 = vector.load %arg3[%c0_3, %c0_4] : memref<1x256xf32, #tpu.memory_space<vmem>>, vector<1x256xf32>
    %4 = vector.broadcast %3 : vector<1x256xf32> to vector<16x256xf32>
    %5 = arith.addf %2, %4 : vector<16x256xf32>
    %cst_5 = arith.constant 0.000000e+00 : f32
    %6 = vector.broadcast %cst_5 : f32 to vector<16x256xf32>
    %7 = arith.cmpf oge, %5, %6 : vector<16x256xf32>
    %cst_6 = arith.constant 1.000000e-01 : f32
    %8 = vector.broadcast %cst_6 : f32 to vector<16x256xf32>
    %9 = arith.mulf %8, %5 : vector<16x256xf32>
    %10 = arith.select %7, %5, %9 : vector<16x256xi1>, vector<16x256xf32>
    %11 = arith.truncf %10 : vector<16x256xf32> to vector<16x256xbf16>
    %c0_7 = arith.constant 0 : index
    %c0_8 = arith.constant 0 : index
    %c0_9 = arith.constant 0 : index
    %12 = vector.load %arg4[%c0_7, %c0_8, %c0_9] : memref<3x256x256xbf16, #tpu.memory_space<vmem>>, vector<1x256x256xbf16>
    %13 = vector.shape_cast %12 : vector<1x256x256xbf16> to vector<256x256xbf16>
    %cst_10 = arith.constant dense<0.000000e+00> : vector<16x256xf32>
    %14 = tpu.matmul %11, %13, %cst_10 {dimension_numbers = #tpu.dot_dimension_numbers<[1], [0], [0], [1], [0, 0, 1, 1], [], []>} : vector<16x256xbf16>, vector<256x256xbf16>, vector<16x256xf32> -> vector<16x256xf32>
    %c1 = arith.constant 1 : index
    %c0_11 = arith.constant 0 : index
    %c0_12 = arith.constant 0 : index
    %15 = vector.load %arg4[%c1, %c0_11, %c0_12] : memref<3x256x256xbf16, #tpu.memory_space<vmem>>, vector<1x256x256xbf16>
    %16 = vector.shape_cast %15 : vector<1x256x256xbf16> to vector<256x256xbf16>
    %cst_13 = arith.constant dense<0.000000e+00> : vector<16x256xf32>
    %17 = tpu.matmul %11, %16, %cst_13 {dimension_numbers = #tpu.dot_dimension_numbers<[1], [0], [0], [1], [0, 0, 1, 1], [], []>} : vector<16x256xbf16>, vector<256x256xbf16>, vector<16x256xf32> -> vector<16x256xf32>
    %c2 = arith.constant 2 : index
    %c0_14 = arith.constant 0 : index
    %c0_15 = arith.constant 0 : index
    %18 = vector.load %arg4[%c2, %c0_14, %c0_15] : memref<3x256x256xbf16, #tpu.memory_space<vmem>>, vector<1x256x256xbf16>
    %19 = vector.shape_cast %18 : vector<1x256x256xbf16> to vector<256x256xbf16>
    %cst_16 = arith.constant dense<0.000000e+00> : vector<16x256xf32>
    %20 = tpu.matmul %11, %19, %cst_16 {dimension_numbers = #tpu.dot_dimension_numbers<[1], [0], [0], [1], [0, 0, 1, 1], [], []>} : vector<16x256xbf16>, vector<256x256xbf16>, vector<16x256xf32> -> vector<16x256xf32>
    %21 = vector.extract_strided_slice %14 {offsets = [0, 0], sizes = [6, 256], strides = [1, 1]} : vector<16x256xf32> to vector<6x256xf32>
    %22 = vector.extract_strided_slice %17 {offsets = [1, 0], sizes = [6, 256], strides = [1, 1]} : vector<16x256xf32> to vector<6x256xf32>
    %23 = arith.addf %21, %22 : vector<6x256xf32>
    %24 = vector.extract_strided_slice %20 {offsets = [2, 0], sizes = [6, 256], strides = [1, 1]} : vector<16x256xf32> to vector<6x256xf32>
    %25 = arith.addf %23, %24 : vector<6x256xf32>
    %c0_17 = arith.constant 0 : index
    %c0_18 = arith.constant 0 : index
    %26 = vector.load %arg5[%c0_17, %c0_18] : memref<1x256xf32, #tpu.memory_space<vmem>>, vector<1x256xf32>
    %27 = vector.broadcast %26 : vector<1x256xf32> to vector<6x256xf32>
    %28 = arith.addf %25, %27 : vector<6x256xf32>
    %cst_19 = arith.constant 0.000000e+00 : f32
    %29 = vector.broadcast %cst_19 : f32 to vector<6x256xf32>
    %30 = arith.cmpf oge, %28, %29 : vector<6x256xf32>
    %cst_20 = arith.constant 1.000000e-01 : f32
    %31 = vector.broadcast %cst_20 : f32 to vector<6x256xf32>
    %32 = arith.mulf %31, %28 : vector<6x256xf32>
    %33 = arith.select %30, %28, %32 : vector<6x256xi1>, vector<6x256xf32>
    %c0_21 = arith.constant 0 : index
    %c0_22 = arith.constant 0 : index
    %34 = vector.load %arg6[%c0_21, %c0_22] : memref<1x256xf32, #tpu.memory_space<vmem>>, vector<1x256xf32>
    %35 = vector.broadcast %34 : vector<1x256xf32> to vector<6x256xf32>
    %36 = arith.mulf %33, %35 : vector<6x256xf32>
    %37 = vector.extract_strided_slice %36 {offsets = [0, 0], sizes = [6, 128], strides = [1, 1]} : vector<6x256xf32> to vector<6x128xf32>
    %38 = vector.shape_cast %37 : vector<6x128xf32> to vector<1x6x128xf32>
    %cst_23 = arith.constant dense<0.000000e+00> : vector<1xf32>
    %39 = vector.multi_reduction <add>, %38, %cst_23 [1, 2] : vector<1x6x128xf32> to vector<1xf32>
    %40 = vector.shape_cast %39 : vector<1xf32> to vector<1x1x1xf32>
    %41 = vector.extract %40[0, 0, 0] : f32 from vector<1x1x1xf32>
    %42 = vector.broadcast %41 : f32 to vector<1x1xf32>
    %43 = vector.extract_strided_slice %10 {offsets = [0, 0], sizes = [8, 128], strides = [1, 1]} : vector<16x256xf32> to vector<8x128xf32>
    %44 = vector.extract_strided_slice %36 {offsets = [0, 128], sizes = [6, 128], strides = [1, 1]} : vector<6x256xf32> to vector<6x128xf32>
    %45 = vector.shape_cast %44 : vector<6x128xf32> to vector<1x6x128xf32>
    %cst_24 = arith.constant dense<0.000000e+00> : vector<1xf32>
    %46 = vector.multi_reduction <add>, %45, %cst_24 [1, 2] : vector<1x6x128xf32> to vector<1xf32>
    %47 = vector.shape_cast %46 : vector<1xf32> to vector<1x1x1xf32>
    %48 = vector.extract %47[0, 0, 0] : f32 from vector<1x1x1xf32>
    %49 = vector.broadcast %48 : f32 to vector<1x1xf32>
    %50 = vector.extract_strided_slice %10 {offsets = [0, 128], sizes = [8, 128], strides = [1, 1]} : vector<16x256xf32> to vector<8x128xf32>
    %51 = vector.extract_strided_slice %14 {offsets = [8, 0], sizes = [6, 256], strides = [1, 1]} : vector<16x256xf32> to vector<6x256xf32>
    %52 = vector.extract_strided_slice %17 {offsets = [9, 0], sizes = [6, 256], strides = [1, 1]} : vector<16x256xf32> to vector<6x256xf32>
    %53 = arith.addf %51, %52 : vector<6x256xf32>
    %54 = vector.extract_strided_slice %20 {offsets = [10, 0], sizes = [6, 256], strides = [1, 1]} : vector<16x256xf32> to vector<6x256xf32>
    %55 = arith.addf %53, %54 : vector<6x256xf32>
    %c0_25 = arith.constant 0 : index
    %c0_26 = arith.constant 0 : index
    %56 = vector.load %arg5[%c0_25, %c0_26] : memref<1x256xf32, #tpu.memory_space<vmem>>, vector<1x256xf32>
    %57 = vector.broadcast %56 : vector<1x256xf32> to vector<6x256xf32>
    %58 = arith.addf %55, %57 : vector<6x256xf32>
    %cst_27 = arith.constant 0.000000e+00 : f32
    %59 = vector.broadcast %cst_27 : f32 to vector<6x256xf32>
    %60 = arith.cmpf oge, %58, %59 : vector<6x256xf32>
    %cst_28 = arith.constant 1.000000e-01 : f32
    %61 = vector.broadcast %cst_28 : f32 to vector<6x256xf32>
    %62 = arith.mulf %61, %58 : vector<6x256xf32>
    %63 = arith.select %60, %58, %62 : vector<6x256xi1>, vector<6x256xf32>
    %c0_29 = arith.constant 0 : index
    %c0_30 = arith.constant 0 : index
    %64 = vector.load %arg6[%c0_29, %c0_30] : memref<1x256xf32, #tpu.memory_space<vmem>>, vector<1x256xf32>
    %65 = vector.broadcast %64 : vector<1x256xf32> to vector<6x256xf32>
    %66 = arith.mulf %63, %65 : vector<6x256xf32>
    %67 = vector.extract_strided_slice %66 {offsets = [0, 0], sizes = [6, 128], strides = [1, 1]} : vector<6x256xf32> to vector<6x128xf32>
    %68 = vector.shape_cast %67 : vector<6x128xf32> to vector<1x6x128xf32>
    %cst_31 = arith.constant dense<0.000000e+00> : vector<1xf32>
    %69 = vector.multi_reduction <add>, %68, %cst_31 [1, 2] : vector<1x6x128xf32> to vector<1xf32>
    %70 = vector.shape_cast %69 : vector<1xf32> to vector<1x1x1xf32>
    %71 = vector.extract %70[0, 0, 0] : f32 from vector<1x1x1xf32>
    %72 = vector.broadcast %71 : f32 to vector<1x1xf32>
    %73 = vector.extract_strided_slice %10 {offsets = [8, 0], sizes = [8, 128], strides = [1, 1]} : vector<16x256xf32> to vector<8x128xf32>
    %74 = vector.extract_strided_slice %66 {offsets = [0, 128], sizes = [6, 128], strides = [1, 1]} : vector<6x256xf32> to vector<6x128xf32>
    %75 = vector.shape_cast %74 : vector<6x128xf32> to vector<1x6x128xf32>
    %cst_32 = arith.constant dense<0.000000e+00> : vector<1xf32>
    %76 = vector.multi_reduction <add>, %75, %cst_32 [1, 2] : vector<1x6x128xf32> to vector<1xf32>
    %77 = vector.shape_cast %76 : vector<1xf32> to vector<1x1x1xf32>
    %78 = vector.extract %77[0, 0, 0] : f32 from vector<1x1x1xf32>
    %79 = vector.broadcast %78 : f32 to vector<1x1xf32>
    %80 = vector.extract_strided_slice %10 {offsets = [8, 128], sizes = [8, 128], strides = [1, 1]} : vector<16x256xf32> to vector<8x128xf32>
    %81 = arith.cmpf oge, %42, %49 : vector<1x1xf32>
    %82 = arith.cmpf oge, %42, %72 : vector<1x1xf32>
    %83 = arith.andi %81, %82 : vector<1x1xi1>
    %84 = arith.cmpf oge, %42, %79 : vector<1x1xf32>
    %85 = arith.andi %83, %84 : vector<1x1xi1>
    %cst_33 = arith.constant dense<true> : vector<1x1xi1>
    %86 = arith.xori %85, %cst_33 : vector<1x1xi1>
    %87 = arith.cmpf oge, %49, %72 : vector<1x1xf32>
    %88 = arith.andi %86, %87 : vector<1x1xi1>
    %89 = arith.cmpf oge, %49, %79 : vector<1x1xf32>
    %90 = arith.andi %88, %89 : vector<1x1xi1>
    %cst_34 = arith.constant dense<true> : vector<1x1xi1>
    %91 = arith.xori %85, %cst_34 : vector<1x1xi1>
    %cst_35 = arith.constant dense<true> : vector<1x1xi1>
    %92 = arith.xori %90, %cst_35 : vector<1x1xi1>
    %93 = arith.andi %91, %92 : vector<1x1xi1>
    %94 = arith.cmpf oge, %72, %79 : vector<1x1xf32>
    %95 = arith.andi %93, %94 : vector<1x1xi1>
    %96 = arith.ori %85, %90 : vector<1x1xi1>
    %97 = arith.ori %96, %95 : vector<1x1xi1>
    %cst_36 = arith.constant dense<true> : vector<1x1xi1>
    %98 = arith.xori %97, %cst_36 : vector<1x1xi1>
    %99 = arith.extui %85 : vector<1x1xi1> to vector<1x1xi32>
    %100 = arith.sitofp %99 : vector<1x1xi32> to vector<1x1xf32>
    %101 = vector.broadcast %100 : vector<1x1xf32> to vector<8x128xf32>
    %102 = arith.mulf %43, %101 : vector<8x128xf32>
    %103 = arith.extui %90 : vector<1x1xi1> to vector<1x1xi32>
    %104 = arith.sitofp %103 : vector<1x1xi32> to vector<1x1xf32>
    %105 = vector.broadcast %104 : vector<1x1xf32> to vector<8x128xf32>
    %106 = arith.mulf %50, %105 : vector<8x128xf32>
    %107 = arith.addf %102, %106 : vector<8x128xf32>
    %108 = arith.extui %95 : vector<1x1xi1> to vector<1x1xi32>
    %109 = arith.sitofp %108 : vector<1x1xi32> to vector<1x1xf32>
    %110 = vector.broadcast %109 : vector<1x1xf32> to vector<8x128xf32>
    %111 = arith.mulf %73, %110 : vector<8x128xf32>
    %112 = arith.addf %107, %111 : vector<8x128xf32>
    %113 = arith.extui %98 : vector<1x1xi1> to vector<1x1xi32>
    %114 = arith.sitofp %113 : vector<1x1xi32> to vector<1x1xf32>
    %115 = vector.broadcast %114 : vector<1x1xf32> to vector<8x128xf32>
    %116 = arith.mulf %80, %115 : vector<8x128xf32>
    %117 = arith.addf %112, %116 : vector<8x128xf32>
    %c0_37 = arith.constant 0 : index
    %c0_38 = arith.constant 0 : index
    %118 = vector.load %arg7[%c0_37, %c0_38] : memref<8x128xf32, #tpu.memory_space<vmem>>, vector<8x128xf32>
    tpu.vector_store %arg7[%c0_37, %c0_38], %117 {strides = array<i32>} : memref<8x128xf32, #tpu.memory_space<vmem>>, vector<8x128xf32>,
    return
  }
  func.func @transform_0(%arg0: i32) -> (i32, i32) {
    %c0_i32 = arith.constant 0 : i32
    %c0_i32_0 = arith.constant 0 : i32
    return %arg0, %c0_i32 : i32, i32
  }
  func.func @transform_1(%arg0: i32) -> (i32, i32) {
    %c0_i32 = arith.constant 0 : i32
    %c0_i32_0 = arith.constant 0 : i32
    %c0_i32_1 = arith.constant 0 : i32
    return %c0_i32, %c0_i32_0 : i32, i32
  }
  func.func @transform_2(%arg0: i32) -> (i32, i32) {
    %c0_i32 = arith.constant 0 : i32
    %c0_i32_0 = arith.constant 0 : i32
    %c0_i32_1 = arith.constant 0 : i32
    return %c0_i32, %c0_i32_0 : i32, i32
  }
  func.func @transform_3(%arg0: i32) -> (i32, i32, i32) {
    %c0_i32 = arith.constant 0 : i32
    %c0_i32_0 = arith.constant 0 : i32
    %c0_i32_1 = arith.constant 0 : i32
    %c0_i32_2 = arith.constant 0 : i32
    return %c0_i32, %c0_i32_0, %c0_i32_1 : i32, i32, i32
  }
  func.func @transform_4(%arg0: i32) -> (i32, i32) {
    %c0_i32 = arith.constant 0 : i32
    %c0_i32_0 = arith.constant 0 : i32
    %c0_i32_1 = arith.constant 0 : i32
    return %c0_i32, %c0_i32_0 : i32, i32
  }
  func.func @transform_5(%arg0: i32) -> (i32, i32) {
    %c0_i32 = arith.constant 0 : i32
    %c0_i32_0 = arith.constant 0 : i32
    %c0_i32_1 = arith.constant 0 : i32
    return %c0_i32, %c0_i32_0 : i32, i32
  }
  func.func @transform_6(%arg0: i32) -> (i32, i32) {
    %c0_i32 = arith.constant 0 : i32
    %c0_i32_0 = arith.constant 0 : i32
    return %arg0, %c0_i32 : i32, i32
  }
}

</mosaic_0001>

<bundles_post_ra>
// kernel: circle_filters_forward.1
= control target key start
LH: loop header
LB: loop body
LE: loop exit
PB: predicated region body
PF: predicated region fallthrough
CT: control target
= control target key end

     0   :  { %s2699_s21 = smov 0   ;;  %s3760_s0 = inlined_call_operand.vmem [shape: bf16[32,512], index: 0, kind: input, shape index: {}]   ;;  %s3761_s1 = inlined_call_operand.vmem [shape: bf16[512,256], index: 1, kind: input, shape index: {}]   ;;  %s3762_s2 = inlined_call_operand.vmem [shape: f32[1,256], index: 2, kind: input, shape index: {}]   ;;  %s3763_s3 = inlined_call_operand.vmem [shape: bf16[3,256,256], index: 3, kind: input, shape index: {}]   ;;  %s3764_s4 = inlined_call_operand.vmem [shape: f32[1,256], index: 4, kind: input, shape index: {}]   ;;  %s3765_s5 = inlined_call_operand.vmem [shape: f32[1,256], index: 5, kind: input, shape index: {}]   ;;  %s3766_s6 = inlined_call_operand.vmem [shape: f32[16,128], index: 6, kind: output, shape index: {}]  }
   0x1 LB: > { %s2705_s22 = sadd.s32 4294967295, %s2660_s21   ;;  %p1740_p0 = scmp.ge.s32.totalorder %s2660_s21, 1  ;;  %s2660_s21 = sphi %s2699_s21, %s16_s21  }
   0x2   : > { %p214_p1 = scmp.lt.s32.totalorder %s2660_s21, 3 }
   0x4   : > { %p215_p2 = pnand %p1740_p0, %p214_p1 }
   0x5   : > { %s1741_s17 = sshll.u32 (!%p215_p2), %s2705_s22, 1  ;;  %p251_p4 = scmp.lt.s32.totalorder (!%p215_p2), %s2705_s22, 1 }
   0x6   : > { %218 = sbr.rel (%p215_p2) target bundleno = 612 (0x264), region = 44  ;;  %p245_p3 = scmp.lt.s32.totalorder (!%p215_p2), %s1741_s17, 3 }
   0xb   : > { %v1819_v0 = vld [vmem:[%s3761_s1 + $0x70] sm:$0xf]  ;;  %v2491_v1 = vld [vmem:[%s3761_s1 + $0x74] sm:$0xf0]  ;;  %v1811_v11 = vld [vmem:[%s3761_s1 + $0x60] sm:$0xf] }
   0xc   : > { %v1883_v2 = vld [vmem:[%s3761_s1 + $0xf0] sm:$0xf]  ;;  %v1820_v3 = vor.u32 %v2491_v1, %v1819_v0  ;;  %v2507_v4 = vld [vmem:[%s3761_s1 + $0xf4] sm:$0xf0]  ;;  %v2489_v13 = vld [vmem:[%s3761_s1 + $0x64] sm:$0xf0] }
   0xd   : > { %v1947_v5 = vld [vmem:[%s3761_s1 + $0x170] sm:$0xf]  ;;  %v2523_v6 = vld [vmem:[%s3761_s1 + $0x174] sm:$0xf0]  ;;  %v1884_v7 = vor.u32 %v2507_v4, %v1883_v2  ;;  %v1875_v14 = vld [vmem:[%s3761_s1 + $0xe0] sm:$0xf]  ;;  %v1812_v16 = vor.u32 %v2489_v13, %v1811_v11 }
   0xe   : > { %v1948_v8 = vor.u32 %v2523_v6, %v1947_v5  ;;  %v2011_v9 = vld [vmem:[%s3761_s1 + $0x1f0] sm:$0xf]  ;;  %v2539_v10 = vld [vmem:[%s3761_s1 + $0x1f4] sm:$0xf0]  ;;  %669 = vmatpush.bf16.msra.mxu0 %v1820_v3  ;;  %v2505_v15 = vld [vmem:[%s3761_s1 + $0xe4] sm:$0xf0] }
   0xf   : > { %v2012_v12 = vor.u32 %v2539_v10, %v2011_v9  ;;  %683 = vmatpush.bf16.msra.mxu1 %v1884_v7  ;;  %v1876_v17 = vor.u32 %v2505_v15, %v1875_v14  ;;  %v1939_v18 = vld [vmem:[%s3761_s1 + $0x160] sm:$0xf]  ;;  %v2521_v19 = vld [vmem:[%s3761_s1 + $0x164] sm:$0xf0]  ;;  %v1803_v23 = vld [vmem:[%s3761_s1 + $0x50] sm:$0xf] }
  0x10   : > { %697 = vmatpush.bf16.msra.mxu2 %v1948_v8  ;;  %v2003_v20 = vld [vmem:[%s3761_s1 + $0x1e0] sm:$0xf]  ;;  %v1940_v21 = vor.u32 %v2521_v19, %v1939_v18  ;;  %v2537_v22 = vld [vmem:[%s3761_s1 + $0x1e4] sm:$0xf0]  ;;  %v2487_v24 = vld [vmem:[%s3761_s1 + $0x54] sm:$0xf0] }
  0x11   : > { %711 = vmatpush.bf16.msra.mxu3 %v2012_v12  ;;  %v2004_v25 = vor.u32 %v2537_v22, %v2003_v20  ;;  %v1867_v26 = vld [vmem:[%s3761_s1 + $0xd0] sm:$0xf]  ;;  %v2503_v27 = vld [vmem:[%s3761_s1 + $0xd4] sm:$0xf0]  ;;  %v1804_v29 = vor.u32 %v2487_v24, %v1803_v23  ;;  %v1795_v35 = vld [vmem:[%s3761_s1 + $0x40] sm:$0xf] }
  0x12   : > { %v1931_v28 = vld [vmem:[%s3761_s1 + $0x150] sm:$0xf]  ;;  %670 = vmatpush.bf16.msra.mxu0 %v1812_v16  ;;  %v2519_v30 = vld [vmem:[%s3761_s1 + $0x154] sm:$0xf0]  ;;  %v1868_v33 = vor.u32 %v2503_v27, %v1867_v26  ;;  %v2485_v36 = vld [vmem:[%s3761_s1 + $0x44] sm:$0xf0] }
  0x13   : > { %v1995_v31 = vld [vmem:[%s3761_s1 + $0x1d0] sm:$0xf]  ;;  %v2535_v32 = vld [vmem:[%s3761_s1 + $0x1d4] sm:$0xf0]  ;;  %684 = vmatpush.bf16.msra.mxu1 %v1876_v17  ;;  %v1932_v34 = vor.u32 %v2519_v30, %v1931_v28  ;;  %v1859_v37 = vld [vmem:[%s3761_s1 + $0xc0] sm:$0xf]  ;;  %v1796_v44 = vor.u32 %v2485_v36, %v1795_v35 }
  0x14   : > { %698 = vmatpush.bf16.msra.mxu2 %v1940_v21  ;;  %v1996_v38 = vor.u32 %v2535_v32, %v1995_v31  ;;  %v2501_v39 = vld [vmem:[%s3761_s1 + $0xc4] sm:$0xf0]  ;;  %v1923_v40 = vld [vmem:[%s3761_s1 + $0x140] sm:$0xf]  ;;  %v1787_v47 = vld [vmem:[%s3761_s1 + $0x30] sm:$0xf] }
  0x15   : > { %712 = vmatpush.bf16.msra.mxu3 %v2004_v25  ;;  %v2517_v41 = vld [vmem:[%s3761_s1 + $0x144] sm:$0xf0]  ;;  %v1987_v42 = vld [vmem:[%s3761_s1 + $0x1c0] sm:$0xf]  ;;  %v1860_v45 = vor.u32 %v2501_v39, %v1859_v37  ;;  %v2483_v48 = vld [vmem:[%s3761_s1 + $0x34] sm:$0xf0] }
  0x16   : > { %v2533_v43 = vld [vmem:[%s3761_s1 + $0x1c4] sm:$0xf0]  ;;  %671 = vmatpush.bf16.msra.mxu0 %v1804_v29  ;;  %v1924_v46 = vor.u32 %v2517_v41, %v1923_v40  ;;  %v1851_v49 = vld [vmem:[%s3761_s1 + $0xb0] sm:$0xf]  ;;  %v2499_v51 = vld [vmem:[%s3761_s1 + $0xb4] sm:$0xf0]  ;;  %v1788_v56 = vor.u32 %v2483_v48, %v1787_v47 }
  0x17   : > { %685 = vmatpush.bf16.msra.mxu1 %v1868_v33  ;;  %v1988_v50 = vor.u32 %v2533_v43, %v1987_v42  ;;  %v1915_v52 = vld [vmem:[%s3761_s1 + $0x130] sm:$0xf]  ;;  %v2515_v53 = vld [vmem:[%s3761_s1 + $0x134] sm:$0xf0]  ;;  %v1852_v57 = vor.u32 %v2499_v51, %v1851_v49  ;;  %v1779_v59 = vld [vmem:[%s3761_s1 + $0x20] sm:$0xf] }
  0x18   : > { %699 = vmatpush.bf16.msra.mxu2 %v1932_v34  ;;  %v1979_v54 = vld [vmem:[%s3761_s1 + $0x1b0] sm:$0xf]  ;;  %v2531_v55 = vld [vmem:[%s3761_s1 + $0x1b4] sm:$0xf0]  ;;  %v1916_v58 = vor.u32 %v2515_v53, %v1915_v52  ;;  %v2481_v60 = vld [vmem:[%s3761_s1 + $0x24] sm:$0xf0] }
  0x19   : > { %713 = vmatpush.bf16.msra.mxu3 %v1996_v38  ;;  %v1843_v61 = vld [vmem:[%s3761_s1 + $0xa0] sm:$0xf]  ;;  %v1980_v62 = vor.u32 %v2531_v55, %v1979_v54  ;;  %v2497_v63 = vld [vmem:[%s3761_s1 + $0xa4] sm:$0xf0]  ;;  %v1780_v4 = vor.u32 %v2481_v60, %v1779_v59  ;;  %v1771_v5 = vld [vmem:[%s3761_s1 + $0x10] sm:$0xf] }
  0x1a   : > { %672 = vmatpush.bf16.msra.mxu0 %v1796_v44  ;;  %v1907_v0 = vld [vmem:[%s3761_s1 + $0x120] sm:$0xf]  ;;  %v2513_v1 = vld [vmem:[%s3761_s1 + $0x124] sm:$0xf0]  ;;  %v1844_v6 = vor.u32 %v2497_v63, %v1843_v61  ;;  %v2479_v8 = vld [vmem:[%s3761_s1 + $0x14] sm:$0xf0] }
  0x1b   : > { %686 = vmatpush.bf16.msra.mxu1 %v1860_v45  ;;  %v1971_v2 = vld [vmem:[%s3761_s1 + $0x1a0] sm:$0xf]  ;;  %v2529_v3 = vld [vmem:[%s3761_s1 + $0x1a4] sm:$0xf0]  ;;  %v1908_v7 = vor.u32 %v2513_v1, %v1907_v0  ;;  %v1835_v9 = vld [vmem:[%s3761_s1 + $0x90] sm:$0xf]  ;;  %v1772_v18 = vor.u32 %v2479_v8, %v1771_v5 }
  0x1c   : > { %700 = vmatpush.bf16.msra.mxu2 %v1924_v46  ;;  %v2495_v10 = vld [vmem:[%s3761_s1 + $0x94] sm:$0xf0]  ;;  %v1972_v11 = vor.u32 %v2529_v3, %v1971_v2  ;;  %v1899_v12 = vld [vmem:[%s3761_s1 + $0x110] sm:$0xf]  ;;  %v1763_v16 = vld [vmem:[%s3761_s1] sm:$0xf] }
  0x1d   : > { %714 = vmatpush.bf16.msra.mxu3 %v1988_v50  ;;  %v2511_v13 = vld [vmem:[%s3761_s1 + $0x114] sm:$0xf0]  ;;  %v1963_v14 = vld [vmem:[%s3761_s1 + $0x190] sm:$0xf]  ;;  %v2477_v17 = vld [vmem:[%s3761_s1 + $0x4] sm:$0xf0]  ;;  %v1836_v23 = vor.u32 %v2495_v10, %v1835_v9 }
  0x1e   : > { %673 = vmatpush.bf16.msra.mxu0 %v1788_v56  ;;  %v2527_v15 = vld [vmem:[%s3761_s1 + $0x194] sm:$0xf0]  ;;  %v1827_v19 = vld [vmem:[%s3761_s1 + $0x80] sm:$0xf]  ;;  %v2493_v20 = vld [vmem:[%s3761_s1 + $0x84] sm:$0xf0]  ;;  %v1900_v24 = vor.u32 %v2511_v13, %v1899_v12  ;;  %v1764_v33 = vor.u32 %v2477_v17, %v1763_v16 }
  0x1f   : > { %687 = vmatpush.bf16.msra.mxu1 %v1852_v57  ;;  %v1891_v21 = vld [vmem:[%s3761_s1 + $0x100] sm:$0xf]  ;;  %v2509_v22 = vld [vmem:[%s3761_s1 + $0x104] sm:$0xf0]  ;;  %v1964_v27 = vor.u32 %v2527_v15, %v1963_v14  ;;  %v2490_v28 = vld [vmem:[%s3761_s1 + $0x74] sm:$0xf]  ;;  %v1828_v36 = vor.u32 %v2493_v20, %v1827_v19 }
  0x20   : > { %701 = vmatpush.bf16.msra.mxu2 %v1916_v58  ;;  %v1955_v25 = vld [vmem:[%s3761_s1 + $0x180] sm:$0xf]  ;;  %v2525_v26 = vld [vmem:[%s3761_s1 + $0x184] sm:$0xf0]  ;;  %v1821_v29 = vld [vmem:[%s3761_s1 + $0x78] sm:$0xf0]  ;;  %v1892_v37 = vor.u32 %v2509_v22, %v1891_v21 }
  0x21   : > { %715 = vmatpush.bf16.msra.mxu3 %v1980_v62  ;;  %v2506_v30 = vld [vmem:[%s3761_s1 + $0xf4] sm:$0xf]  ;;  %v1885_v31 = vld [vmem:[%s3761_s1 + $0xf8] sm:$0xf0]  ;;  %s3770_s17 = smov (!%p245_p3, %s1741_s17), 3  ;;  %v1956_v41 = vor.u32 %v2525_v26, %v1955_v25  ;;  %v1824_v42 = vor.u32 %v2490_v28, %v1821_v29  ;;  %vm1579_vm5 = vcmask 1045504  }
  0x22   : > { %674 = vmatpush.bf16.msra.mxu0 %v1780_v4  ;;  %v2522_v32 = vld [vmem:[%s3761_s1 + $0x174] sm:$0xf]  ;;  %v1949_v34 = vld [vmem:[%s3761_s1 + $0x178] sm:$0xf0]  ;;  %v2488_v39 = vld [vmem:[%s3761_s1 + $0x64] sm:$0xf]  ;;  %v1888_v46 = vor.u32 %v2506_v30, %v1885_v31 }
  0x23   : > { %688 = vmatpush.bf16.msra.mxu1 %v1844_v6  ;;  %v2538_v35 = vld [vmem:[%s3761_s1 + $0x1f4] sm:$0xf]  ;;  %v2013_v38 = vld [vmem:[%s3761_s1 + $0x1f8] sm:$0xf0]  ;;  %v1813_v40 = vld [vmem:[%s3761_s1 + $0x68] sm:$0xf0]  ;;  %v1952_v47 = vor.u32 %v2522_v32, %v1949_v34 }
  0x24   : > { %702 = vmatpush.bf16.msra.mxu2 %v1908_v7  ;;  %s2471_s16 = sshll.u32 %s3770_s17, 4  ;;  %v2504_v43 = vld [vmem:[%s3761_s1 + $0xe4] sm:$0xf]  ;;  %v1877_v44 = vld [vmem:[%s3761_s1 + $0xe8] sm:$0xf0]  ;;  %v2016_v51 = vor.u32 %v2538_v35, %v2013_v38  ;;  %v1816_v61 = vor.u32 %v2488_v39, %v1813_v40  ;;  %vm2662_vm15 = vmmov 1  }
  0x25   : > { %716 = vmatpush.bf16.msra.mxu3 %v1972_v11  ;;  %v2520_v45 = vld [vmem:[%s3761_s1 + $0x164] sm:$0xf]  ;;  %s249_s28 = scalar_lea.vmem %s3760_s0, %s2471_s16  ;;  %v1941_v48 = vld [vmem:[%s3761_s1 + $0x168] sm:$0xf0]  ;;  %v1880_v0 = vor.u32 %v2504_v43, %v1877_v44  ;;  %v2486_v3 = vld [vmem:[%s3761_s1 + $0x54] sm:$0xf] }
  0x26   : > { %675 = vmatpush.bf16.msra.mxu0 %v1772_v18  ;;  %v2536_v49 = vld [vmem:[%s3761_s1 + $0x1e4] sm:$0xf]  ;;  %v2005_v50 = vld [vmem:[%s3761_s1 + $0x1e8] sm:$0xf0]  ;;  %v1755_v52 = vld [vmem:[%s249_s28 + $0x8] sm:$0xf]  ;;  %v1944_v1 = vor.u32 %v2520_v45, %v1941_v48 }
  0x27   : > { %689 = vmatpush.bf16.msra.mxu1 %v1836_v23  ;;  %v2475_v53 = vld [vmem:[%s249_s28 + $0x14] sm:$0xf0]  ;;  %v1747_v54 = vld [vmem:[%s249_s28] sm:$0xf]  ;;  %v2474_v56 = vld [vmem:[%s249_s28 + $0xc] sm:$0xf0]  ;;  %v2008_v6 = vor.u32 %v2536_v49, %v2005_v50 }
  0x28   : > { %703 = vmatpush.bf16.msra.mxu2 %v1900_v24  ;;  %v2953_v55 = vor.u32 %v2475_v53, %v1755_v52  ;;  %v2473_v57 = vld [vmem:[%s249_s28 + $0xc] sm:$0xf]  ;;  %v1757_v58 = vld [vmem:[%s249_s28 + $0x18] sm:$0xf0]  ;;  %v2955_v59 = vor.u32 %v2474_v56, %v1747_v54  ;;  %v2472_v62 = vld [vmem:[%s249_s28 + $0x4] sm:$0xf] }
  0x29   : > { %717 = vmatpush.bf16.msra.mxu3 %v1964_v27  ;;  %v2957_v60 = vor.u32 %v2473_v57, %v1757_v58  ;;  %v1749_v63 = vld [vmem:[%s249_s28 + $0x10] sm:$0xf0]  ;;  %v1805_v4 = vld [vmem:[%s3761_s1 + $0x58] sm:$0xf0]  ;;  %v2484_v15 = vld [vmem:[%s3761_s1 + $0x44] sm:$0xf] }
  0x2a   : > { %676 = vmatpush.bf16.msra.mxu0 %v1764_v33  ;;  %v2959_v2 = vor.u32 %v2472_v62, %v1749_v63  ;;  %v2502_v5 = vld [vmem:[%s3761_s1 + $0xd4] sm:$0xf]  ;;  %v1869_v7 = vld [vmem:[%s3761_s1 + $0xd8] sm:$0xf0]  ;;  %v1808_v12 = vor.u32 %v2486_v3, %v1805_v4  ;;  %v1797_v16 = vld [vmem:[%s3761_s1 + $0x48] sm:$0xf0] }
  0x2b   : > { %690 = vmatpush.bf16.msra.mxu1 %v1828_v36  ;;  %v2518_v8 = vld [vmem:[%s3761_s1 + $0x154] sm:$0xf]  ;;  %v1933_v9 = vld [vmem:[%s3761_s1 + $0x158] sm:$0xf0]  ;;  %v1872_v13 = vor.u32 %v2502_v5, %v1869_v7  ;;  %v2500_v17 = vld [vmem:[%s3761_s1 + $0xc4] sm:$0xf]  ;;  %v1800_v24 = vor.u32 %v2484_v15, %v1797_v16 }
  0x2c   : > { %704 = vmatpush.bf16.msra.mxu2 %v1892_v37  ;;  %v2534_v10 = vld [vmem:[%s3761_s1 + $0x1d4] sm:$0xf]  ;;  %v1997_v11 = vld [vmem:[%s3761_s1 + $0x1d8] sm:$0xf0]  ;;  %v1936_v14 = vor.u32 %v2518_v8, %v1933_v9  ;;  %v1861_v19 = vld [vmem:[%s3761_s1 + $0xc8] sm:$0xf0] }
  0x2d   : > { %718 = vmatpush.bf16.msra.mxu3 %v1956_v41  ;;  %677 = vmatmul.bf16.vlgmr.msra.gmra.mxu0 %v2955_v59  ;;  %v2000_v18 = vor.u32 %v2534_v10, %v1997_v11  ;;  %v2516_v20 = vld [vmem:[%s3761_s1 + $0x144] sm:$0xf]  ;;  %v1925_v21 = vld [vmem:[%s3761_s1 + $0x148] sm:$0xf0]  ;;  %v1864_v25 = vor.u32 %v2500_v17, %v1861_v19  ;;  %v2482_v27 = vld [vmem:[%s3761_s1 + $0x34] sm:$0xf] }
  0x2e   : > { %725 = vmatpush.bf16.msrb.mxu0 %v1824_v42  ;;  %691 = vmatmul.bf16.vlgmr.msra.gmra.mxu1 %v2959_v2  ;;  %v2532_v22 = vld [vmem:[%s3761_s1 + $0x1c4] sm:$0xf]  ;;  %v1989_v23 = vld [vmem:[%s3761_s1 + $0x1c8] sm:$0xf0]  ;;  %v1928_v26 = vor.u32 %v2516_v20, %v1925_v21  ;;  %v1789_v28 = vld [vmem:[%s3761_s1 + $0x38] sm:$0xf0] }
  0x2f   : > { %739 = vmatpush.bf16.msrb.mxu1 %v1888_v46  ;;  %705 = vmatmul.bf16.vlgmr.msra.gmra.mxu2 %v2953_v55  ;;  %v2498_v29 = vld [vmem:[%s3761_s1 + $0xb4] sm:$0xf]  ;;  %v1992_v30 = vor.u32 %v2532_v22, %v1989_v23  ;;  %v1853_v31 = vld [vmem:[%s3761_s1 + $0xb8] sm:$0xf0]  ;;  %v1792_v36 = vor.u32 %v2482_v27, %v1789_v28  ;;  %v2480_v39 = vld [vmem:[%s3761_s1 + $0x24] sm:$0xf] }
  0x30   : > { %753 = vmatpush.bf16.msrb.mxu2 %v1952_v47  ;;  %719 = vmatmul.bf16.vlgmr.msra.gmra.mxu3 %v2957_v60  ;;  %v2514_v32 = vld [vmem:[%s3761_s1 + $0x134] sm:$0xf]  ;;  %v1917_v33 = vld [vmem:[%s3761_s1 + $0x138] sm:$0xf0]  ;;  %v1856_v37 = vor.u32 %v2498_v29, %v1853_v31  ;;  %v1781_v40 = vld [vmem:[%s3761_s1 + $0x28] sm:$0xf0] }
  0x31   : > { %767 = vmatpush.bf16.msrb.mxu3 %v2016_v51  ;;  %v2530_v34 = vld [vmem:[%s3761_s1 + $0x1b4] sm:$0xf]  ;;  %v1981_v35 = vld [vmem:[%s3761_s1 + $0x1b8] sm:$0xf0]  ;;  %v1920_v38 = vor.u32 %v2514_v32, %v1917_v33  ;;  %v2496_v41 = vld [vmem:[%s3761_s1 + $0xa4] sm:$0xf]  ;;  %v1784_v48 = vor.u32 %v2480_v39, %v1781_v40 }
  0x32   : > { %726 = vmatpush.bf16.msrb.mxu0 %v1816_v61  ;;  %v1984_v42 = vor.u32 %v2530_v34, %v1981_v35  ;;  %v1845_v43 = vld [vmem:[%s3761_s1 + $0xa8] sm:$0xf0]  ;;  %v2512_v44 = vld [vmem:[%s3761_s1 + $0x124] sm:$0xf]  ;;  %v2478_v51 = vld [vmem:[%s3761_s1 + $0x14] sm:$0xf] }
  0x33   : > { %740 = vmatpush.bf16.msrb.mxu1 %v1880_v0  ;;  %v1909_v45 = vld [vmem:[%s3761_s1 + $0x128] sm:$0xf0]  ;;  %v2528_v46 = vld [vmem:[%s3761_s1 + $0x1a4] sm:$0xf]  ;;  %v1848_v49 = vor.u32 %v2496_v41, %v1845_v43  ;;  %v1773_v52 = vld [vmem:[%s3761_s1 + $0x18] sm:$0xf0] }
  0x34   : > { %754 = vmatpush.bf16.msrb.mxu2 %v1944_v1  ;;  %v1973_v47 = vld [vmem:[%s3761_s1 + $0x1a8] sm:$0xf0]  ;;  %v1912_v50 = vor.u32 %v2512_v44, %v1909_v45  ;;  %v2494_v53 = vld [vmem:[%s3761_s1 + $0x94] sm:$0xf]  ;;  %v1837_v56 = vld [vmem:[%s3761_s1 + $0x98] sm:$0xf0]  ;;  %v1776_v63 = vor.u32 %v2478_v51, %v1773_v52 }
  0x35   : > { %768 = vmatpush.bf16.msrb.mxu3 %v2008_v6  ;;  %v1976_v54 = vor.u32 %v2528_v46, %v1973_v47  ;;  %v2510_v57 = vld [vmem:[%s3761_s1 + $0x114] sm:$0xf]  ;;  %v1901_v58 = vld [vmem:[%s3761_s1 + $0x118] sm:$0xf0]  ;;  %v2476_v0 = vld [vmem:[%s3761_s1 + $0x4] sm:$0xf]  ;;  %v1840_v1 = vor.u32 %v2494_v53, %v1837_v56 }
  0x36   : > { %727 = vmatpush.bf16.msrb.mxu0 %v1808_v12  ;;  %v2526_v61 = vld [vmem:[%s3761_s1 + $0x194] sm:$0xf]  ;;  %v1965_v62 = vld [vmem:[%s3761_s1 + $0x198] sm:$0xf0]  ;;  %v1904_v3 = vor.u32 %v2510_v57, %v1901_v58  ;;  %v1765_v4 = vld [vmem:[%s3761_s1 + $0x8] sm:$0xf0] }
  0x37   : > { %741 = vmatpush.bf16.msrb.mxu1 %v1872_v13  ;;  %v2492_v5 = vld [vmem:[%s3761_s1 + $0x84] sm:$0xf]  ;;  %v1829_v6 = vld [vmem:[%s3761_s1 + $0x88] sm:$0xf0]  ;;  %v1968_v7 = vor.u32 %v2526_v61, %v1965_v62  ;;  %v2075_v12 = vld [vmem:[%s3763_s3 + $0x70] sm:$0xf] }
  0x38   : > { %755 = vmatpush.bf16.msrb.mxu2 %v1936_v14  ;;  %v2508_v8 = vld [vmem:[%s3761_s1 + $0x104] sm:$0xf]  ;;  %v1893_v9 = vld [vmem:[%s3761_s1 + $0x108] sm:$0xf0]  ;;  %v2555_v13 = vld [vmem:[%s3763_s3 + $0x74] sm:$0xf0]  ;;  %v1768_v14 = vor.u32 %v2476_v0, %v1765_v4  ;;  %v1832_v17 = vor.u32 %v2492_v5, %v1829_v6 }
  0x39   : > { %769 = vmatpush.bf16.msrb.mxu3 %v2000_v18  ;;  %v2524_v10 = vld [vmem:[%s3761_s1 + $0x184] sm:$0xf]  ;;  %v1957_v11 = vld [vmem:[%s3761_s1 + $0x188] sm:$0xf0]  ;;  %v2554_v15 = vld [vmem:[%s3763_s3 + $0x74] sm:$0xf]  ;;  %v1896_v18 = vor.u32 %v2508_v8, %v1893_v9  ;;  %v2076_v20 = vor.u32 %v2555_v13, %v2075_v12 }
  0x3a   : > { %728 = vmatpush.bf16.msrb.mxu0 %v1800_v24  ;;  %v2077_v16 = vld [vmem:[%s3763_s3 + $0x78] sm:$0xf0]  ;;  %v1960_v19 = vor.u32 %v2524_v10, %v1957_v11  ;;  %v2067_v21 = vld [vmem:[%s3763_s3 + $0x60] sm:$0xf]  ;;  %v2553_v22 = vld [vmem:[%s3763_s3 + $0x64] sm:$0xf0] }
  0x3b   : > { %742 = vmatpush.bf16.msrb.mxu1 %v1864_v25  ;;  %v2080_v23 = vor.u32 %v2554_v15, %v2077_v16  ;;  %v2139_v24 = vld [vmem:[%s3763_s3 + $0xf0] sm:$0xf]  ;;  %v2571_v25 = vld [vmem:[%s3763_s3 + $0xf4] sm:$0xf0]  ;;  %v2552_v27 = vld [vmem:[%s3763_s3 + $0x64] sm:$0xf]  ;;  %v2068_v31 = vor.u32 %v2553_v22, %v2067_v21 }
  0x3c   : > { %756 = vmatpush.bf16.msrb.mxu2 %v1928_v26  ;;  %v2570_v26 = vld [vmem:[%s3763_s3 + $0xf4] sm:$0xf]  ;;  %v2069_v28 = vld [vmem:[%s3763_s3 + $0x68] sm:$0xf0]  ;;  %v2141_v29 = vld [vmem:[%s3763_s3 + $0xf8] sm:$0xf0] }
  0x3d   : > { %770 = vmatpush.bf16.msrb.mxu3 %v1992_v30  ;;  %v2140_v30 = vor.u32 %v2571_v25, %v2139_v24  ;;  %v2059_v32 = vld [vmem:[%s3763_s3 + $0x50] sm:$0xf]  ;;  %v2144_v33 = vor.u32 %v2570_v26, %v2141_v29  ;;  %v2131_v34 = vld [vmem:[%s3763_s3 + $0xe0] sm:$0xf]  ;;  %v2569_v35 = vld [vmem:[%s3763_s3 + $0xe4] sm:$0xf0] }
  0x3e   : > { %729 = vmatpush.bf16.msrb.mxu0 %v1792_v36  ;;  %v2072_v36 = vor.u32 %v2552_v27, %v2069_v28  ;;  %v2133_v39 = vld [vmem:[%s3763_s3 + $0xe8] sm:$0xf0]  ;;  %v2061_v40 = vld [vmem:[%s3763_s3 + $0x58] sm:$0xf0]  ;;  %v2132_v41 = vor.u32 %v2569_v35, %v2131_v34  ;;  %v2549_v44 = vld [vmem:[%s3763_s3 + $0x44] sm:$0xf0] }
  0x3f   : > { %743 = vmatpush.bf16.msrb.mxu1 %v1856_v37  ;;  %v2551_v37 = vld [vmem:[%s3763_s3 + $0x54] sm:$0xf0]  ;;  %v2053_v45 = vld [vmem:[%s3763_s3 + $0x48] sm:$0xf0]  ;;  %v2045_v51 = vld [vmem:[%s3763_s3 + $0x38] sm:$0xf0] }
  0x40   : > { %757 = vmatpush.bf16.msrb.mxu2 %v1920_v38  ;;  %v2568_v38 = vld [vmem:[%s3763_s3 + $0xe4] sm:$0xf]  ;;  %v2545_v56 = vld [vmem:[%s3763_s3 + $0x24] sm:$0xf0]  ;;  %v2037_v58 = vld [vmem:[%s3763_s3 + $0x28] sm:$0xf0] }
  0x41   : > { %771 = vmatpush.bf16.msrb.mxu3 %v1984_v42  ;;  %v2060_v42 = vor.u32 %v2551_v37, %v2059_v32  ;;  %v2136_v43 = vor.u32 %v2568_v38, %v2133_v39  ;;  %v2544_v57 = vld [vmem:[%s3763_s3 + $0x24] sm:$0xf]  ;;  %v2543_v0 = vld [vmem:[%s3763_s3 + $0x14] sm:$0xf0]  ;;  %v2019_v6 = vld [vmem:[%s3763_s3] sm:$0xf] }
  0x42   : > { %730 = vmatpush.bf16.msrb.mxu0 %v1784_v48  ;;  %v2043_v48 = vld [vmem:[%s3763_s3 + $0x30] sm:$0xf]  ;;  %v2040_v62 = vor.u32 %v2544_v57, %v2037_v58  ;;  %v2540_v8 = vld [vmem:[%s3763_s3 + $0x4] sm:$0xf]  ;;  %v2021_v9 = vld [vmem:[%s3763_s3 + $0x8] sm:$0xf0] }
  0x43   : > { %744 = vmatpush.bf16.msrb.mxu1 %v1848_v49  ;;  %v2547_v49 = vld [vmem:[%s3763_s3 + $0x34] sm:$0xf0]  ;;  %v2235_v10 = vld [vmem:[%s3763_s3 + $0x170] sm:$0xf]  ;;  %v2586_v12 = vld [vmem:[%s3763_s3 + $0x174] sm:$0xf]  ;;  %v2024_v15 = vor.u32 %v2540_v8, %v2021_v9 }
  0x44   : > { %758 = vmatpush.bf16.msrb.mxu2 %v1912_v50  ;;  %v2546_v50 = vld [vmem:[%s3763_s3 + $0x34] sm:$0xf]  ;;  %v2044_v52 = vor.u32 %v2547_v49, %v2043_v48  ;;  %v2587_v11 = vld [vmem:[%s3763_s3 + $0x174] sm:$0xf0]  ;;  %v2237_v13 = vld [vmem:[%s3763_s3 + $0x178] sm:$0xf0] }
  0x45   : > { %772 = vmatpush.bf16.msrb.mxu3 %v1976_v54  ;;  %v2048_v53 = vor.u32 %v2546_v50, %v2045_v51  ;;  %v2035_v54 = vld [vmem:[%s3763_s3 + $0x20] sm:$0xf]  ;;  %v2236_v16 = vor.u32 %v2587_v11, %v2235_v10  ;;  %v2229_v21 = vld [vmem:[%s3763_s3 + $0x168] sm:$0xf0]  ;;  %v2123_v24 = vld [vmem:[%s3763_s3 + $0xd0] sm:$0xf] }
  0x46   : > { %731 = vmatpush.bf16.msrb.mxu0 %v1776_v63  ;;  %v2036_v61 = vor.u32 %v2545_v56, %v2035_v54  ;;  %v2027_v63 = vld [vmem:[%s3763_s3 + $0x10] sm:$0xf]  ;;  %v2567_v25 = vld [vmem:[%s3763_s3 + $0xd4] sm:$0xf0]  ;;  %v2566_v26 = vld [vmem:[%s3763_s3 + $0xd4] sm:$0xf] }
  0x47   : > { %745 = vmatpush.bf16.msrb.mxu1 %v1840_v1  ;;  %v2542_v1 = vld [vmem:[%s3763_s3 + $0x14] sm:$0xf]  ;;  %v2028_v4 = vor.u32 %v2543_v0, %v2027_v63  ;;  %v2124_v27 = vor.u32 %v2567_v25, %v2123_v24  ;;  %v2125_v28 = vld [vmem:[%s3763_s3 + $0xd8] sm:$0xf0]  ;;  %v2219_v29 = vld [vmem:[%s3763_s3 + $0x150] sm:$0xf] }
  0x48   : > { %759 = vmatpush.bf16.msrb.mxu2 %v1904_v3  ;;  %v2029_v3 = vld [vmem:[%s3763_s3 + $0x18] sm:$0xf0]  ;;  %v2565_v37 = vld [vmem:[%s3763_s3 + $0xc4] sm:$0xf0]  ;;  %v2564_v38 = vld [vmem:[%s3763_s3 + $0xc4] sm:$0xf] }
  0x49   : > { %773 = vmatpush.bf16.msrb.mxu3 %v1968_v7  ;;  %v2032_v5 = vor.u32 %v2542_v1, %v2029_v3  ;;  %v2541_v7 = vld [vmem:[%s3763_s3 + $0x4] sm:$0xf0]  ;;  %v2221_v34 = vld [vmem:[%s3763_s3 + $0x158] sm:$0xf0]  ;;  %v2203_v49 = vld [vmem:[%s3763_s3 + $0x130] sm:$0xf] }
  0x4a   : > { %732 = vmatpush.bf16.msrb.mxu0 %v1768_v14  ;;  %v2020_v14 = vor.u32 %v2541_v7, %v2019_v6  ;;  %v2109_v48 = vld [vmem:[%s3763_s3 + $0xb8] sm:$0xf0]  ;;  %v2579_v50 = vld [vmem:[%s3763_s3 + $0x134] sm:$0xf0]  ;;  %v2099_v57 = vld [vmem:[%s3763_s3 + $0xa0] sm:$0xf] }
  0x4b   : > { %746 = vmatpush.bf16.msrb.mxu1 %v1832_v17  ;;  %v2240_v17 = vor.u32 %v2586_v12, %v2237_v13  ;;  %v2205_v54 = vld [vmem:[%s3763_s3 + $0x138] sm:$0xf0]  ;;  %v2561_v58 = vld [vmem:[%s3763_s3 + $0xa4] sm:$0xf0]  ;;  %v2101_v63 = vld [vmem:[%s3763_s3 + $0xa8] sm:$0xf0] }
  0x4c   : > { %760 = vmatpush.bf16.msrb.mxu2 %v1896_v18  ;;  %v2227_v18 = vld [vmem:[%s3763_s3 + $0x160] sm:$0xf]  ;;  %v2577_v1 = vld [vmem:[%s3763_s3 + $0x124] sm:$0xf0]  ;;  %v2197_v6 = vld [vmem:[%s3763_s3 + $0x128] sm:$0xf0] }
  0x4d   : > { %774 = vmatpush.bf16.msrb.mxu3 %v1960_v19  ;;  %733 = vmatmul.bf16.vlgmr.msrb.gmra.mxu0 %v2955_v59  ;;  %v2550_v59 = vld [vmem:[%s3763_s3 + $0x54] sm:$0xf]  ;;  %v2585_v19 = vld [vmem:[%s3763_s3 + $0x164] sm:$0xf0]  ;;  %v2195_v0 = vld [vmem:[%s3763_s3 + $0x120] sm:$0xf] }
  0x4e   : > { %987 = vmatpush.bf16.msra.mxu0 %v2076_v20  ;;  %747 = vmatmul.bf16.vlgmr.msrb.gmra.mxu1 %v2959_v2  ;;  %v2064_v2 = vor.u32 %v2550_v59, %v2061_v40  ;;  %v2584_v20 = vld [vmem:[%s3763_s3 + $0x164] sm:$0xf]  ;;  %v2228_v22 = vor.u32 %v2585_v19, %v2227_v18  ;;  %v2117_v59 = vld [vmem:[%s3763_s3 + $0xc8] sm:$0xf0]  ;;  %v2211_v40 = vld [vmem:[%s3763_s3 + $0x140] sm:$0xf] }
  0x4f   : > { %761 = vmatmul.bf16.vlgmr.msrb.gmra.mxu2 %v2953_v55  ;;  %1001 = vmatpush.bf16.msra.mxu1 %v2140_v30  ;;  %v2051_v55 = vld [vmem:[%s3763_s3 + $0x40] sm:$0xf]  ;;  %v2583_v30 = vld [vmem:[%s3763_s3 + $0x154] sm:$0xf0]  ;;  %v2091_v8 = vld [vmem:[%s3763_s3 + $0x90] sm:$0xf] }
  0x50   : > { %1015 = vmatpush.bf16.msra.mxu2 %v2080_v23  ;;  %775 = vmatmul.bf16.vlgmr.msrb.gmra.mxu3 %v2957_v60  ;;  %v2548_v60 = vld [vmem:[%s3763_s3 + $0x44] sm:$0xf]  ;;  %v2052_v46 = vor.u32 %v2549_v44, %v2051_v55  ;;  %v2232_v23 = vor.u32 %v2584_v20, %v2229_v21  ;;  %v2220_v32 = vor.u32 %v2583_v30, %v2219_v29  ;;  %v2213_v55 = vld [vmem:[%s3763_s3 + $0x148] sm:$0xf0]  ;;  %v2559_v9 = vld [vmem:[%s3763_s3 + $0x94] sm:$0xf0] }
  0x51   : > { %1029 = vmatpush.bf16.msra.mxu3 %v2144_v33  ;;  %v2056_v47 = vor.u32 %v2548_v60, %v2053_v45  ;;  %v2582_v33 = vld [vmem:[%s3763_s3 + $0x154] sm:$0xf]  ;;  %v2107_v60 = vld [vmem:[%s3763_s3 + $0xb0] sm:$0xf]  ;;  %v2563_v45 = vld [vmem:[%s3763_s3 + $0xb4] sm:$0xf0]  ;;  %v2092_v11 = vor.u32 %v2559_v9, %v2091_v8 }
  0x52   : > { %988 = vmatpush.bf16.msra.mxu0 %v2068_v31  ;;  %v2128_v31 = vor.u32 %v2566_v26, %v2125_v28  ;;  %v2224_v35 = vor.u32 %v2582_v33, %v2221_v34  ;;  %v2558_v10 = vld [vmem:[%s3763_s3 + $0x94] sm:$0xf]  ;;  %v2093_v12 = vld [vmem:[%s3763_s3 + $0x98] sm:$0xf0]  ;;  %v2187_v13 = vld [vmem:[%s3763_s3 + $0x110] sm:$0xf] }
  0x53   : > { %1002 = vmatpush.bf16.msra.mxu1 %v2132_v41  ;;  %v2581_v41 = vld [vmem:[%s3763_s3 + $0x144] sm:$0xf0]  ;;  %v2189_v18 = vld [vmem:[%s3763_s3 + $0x118] sm:$0xf0]  ;;  %v2083_v20 = vld [vmem:[%s3763_s3 + $0x80] sm:$0xf] }
  0x54   : > { %1016 = vmatpush.bf16.msra.mxu2 %v2072_v36  ;;  %v2115_v36 = vld [vmem:[%s3763_s3 + $0xc0] sm:$0xf]  ;;  %v2557_v21 = vld [vmem:[%s3763_s3 + $0x84] sm:$0xf0]  ;;  %v2085_v24 = vld [vmem:[%s3763_s3 + $0x88] sm:$0xf0] }
  0x55   : > { %1030 = vmatpush.bf16.msra.mxu3 %v2136_v43  ;;  %v2116_v39 = vor.u32 %v2565_v37, %v2115_v36  ;;  %v2212_v43 = vor.u32 %v2581_v41, %v2211_v40  ;;  %v2179_v25 = vld [vmem:[%s3763_s3 + $0x100] sm:$0xf]  ;;  %v2573_v26 = vld [vmem:[%s3763_s3 + $0x104] sm:$0xf0]  ;;  %v2572_v29 = vld [vmem:[%s3763_s3 + $0x104] sm:$0xf] }
  0x56   : > { %989 = vmatpush.bf16.msra.mxu0 %v2060_v42  ;;  %v2120_v42 = vor.u32 %v2564_v38, %v2117_v59  ;;  %v2180_v28 = vor.u32 %v2573_v26, %v2179_v25  ;;  %v2181_v30 = vld [vmem:[%s3763_s3 + $0x108] sm:$0xf0]  ;;  %v2603_v33 = vld [vmem:[%s3763_s3 + $0x1f4] sm:$0xf0]  ;;  %v2602_v34 = vld [vmem:[%s3763_s3 + $0x1f4] sm:$0xf] }
  0x57   : > { %1003 = vmatpush.bf16.msra.mxu1 %v2124_v27  ;;  %v3416_v36 = vld [vmem:[%s3762_s2] sm:$0x3]  ;;  %v2601_v59 = vld [vmem:[%s3763_s3 + $0x1e4] sm:$0xf0]  ;;  %v2600_v40 = vld [vmem:[%s3763_s3 + $0x1e4] sm:$0xf] }
  0x58   : > { %1017 = vmatpush.bf16.msra.mxu2 %v2064_v2  ;;  %v2580_v2 = vld [vmem:[%s3763_s3 + $0x144] sm:$0xf]  ;;  %v2293_v41 = vld [vmem:[%s3763_s3 + $0x1e8] sm:$0xf0]  ;;  %v2395_v26 = vld [vmem:[%s3763_s3 + $0x270] sm:$0xf] }
  0x59   : > { %1031 = vmatpush.bf16.msra.mxu3 %v2128_v31  ;;  %v2216_v44 = vor.u32 %v2580_v2, %v2213_v55  ;;  %v2299_v31 = vld [vmem:[%s3763_s3 + $0x1f0] sm:$0xf]  ;;  %v2296_v2 = vor.u32 %v2600_v40, %v2293_v41  ;;  %v2387_v41 = vld [vmem:[%s3763_s3 + $0x260] sm:$0xf]  ;;  %s3772_s22 = smov (!%p251_p4, %s2705_s22), 1 }
  0x5a   : > { %990 = vmatpush.bf16.msra.mxu0 %v2052_v46  ;;  %v2562_v46 = vld [vmem:[%s3763_s3 + $0xb4] sm:$0xf]  ;;  %v2300_v37 = vor.u32 %v2603_v33, %v2299_v31  ;;  %v2283_v55 = vld [vmem:[%s3763_s3 + $0x1d0] sm:$0xf]  ;;  %v2397_v31 = vld [vmem:[%s3763_s3 + $0x278] sm:$0xf0] }
  0x5b   : > { %1004 = vmatpush.bf16.msra.mxu1 %v2116_v39  ;;  %v2112_v51 = vor.u32 %v2562_v46, %v2109_v48  ;;  %v2291_v39 = vld [vmem:[%s3763_s3 + $0x1e0] sm:$0xf]  ;;  %s1744_s16 = sshll.u32 %s3772_s22, 3 }
  0x5c   : > { %1018 = vmatpush.bf16.msra.mxu2 %v2056_v47  ;;  %v2108_v47 = vor.u32 %v2563_v45, %v2107_v60  ;;  %v2598_v60 = vld [vmem:[%s3763_s3 + $0x1d4] sm:$0xf]  ;;  %s254_s20 = scalar_lea.vmem %s3766_s6, %s1744_s16 }
  0x5d   : > { %1032 = vmatpush.bf16.msra.mxu3 %v2120_v42  ;;  %v325_v42 = vperm.slane %v3416_v36, 0 }
  0x5e   : > { %991 = vmatpush.bf16.msra.mxu0 %v2044_v52  ;;  %v2204_v52 = vor.u32 %v2579_v50, %v2203_v49 }
  0x5f   : > { %1005 = vmatpush.bf16.msra.mxu1 %v2108_v47  ;;  %v2285_v47 = vld [vmem:[%s3763_s3 + $0x1d8] sm:$0xf0] }
  0x60   : > { %1019 = vmatpush.bf16.msra.mxu2 %v2048_v53  ;;  %v2578_v53 = vld [vmem:[%s3763_s3 + $0x134] sm:$0xf]  ;;  %v2288_v50 = vor.u32 %v2598_v60, %v2285_v47 }
  0x61   : > { %v2208_v56 = vor.u32 %v2578_v53, %v2205_v54  ;;  %1033 = vmatpush.bf16.msra.mxu3 %v2112_v51  ;;  %v2597_v53 = vld [vmem:[%s3763_s3 + $0x1c4] sm:$0xf0]  ;;  %v2596_v54 = vld [vmem:[%s3763_s3 + $0x1c4] sm:$0xf] }
  0x62   : > { %992 = vmatpush.bf16.msra.mxu0 %v2036_v61  ;;  %v2560_v61 = vld [vmem:[%s3763_s3 + $0xa4] sm:$0xf] }
  0x63   : > { %v2104_v3 = vor.u32 %v2560_v61, %v2101_v63 }
  0x64   : > { %1020 = vmatpush.bf16.msra.mxu2 %v2040_v62  ;;  %v2100_v62 = vor.u32 %v2561_v58, %v2099_v57  ;;  %v2277_v57 = vld [vmem:[%s3763_s3 + $0x1c8] sm:$0xf0] }
  0x65   : > { %1034 = vmatpush.bf16.msra.mxu3 %v2104_v3  ;;  %v2280_v61 = vor.u32 %v2596_v54, %v2277_v57  ;;  %v2594_v3 = vld [vmem:[%s3763_s3 + $0x1b4] sm:$0xf]  ;;  %v2371_v57 = vld [vmem:[%s3763_s3 + $0x240] sm:$0xf] }
  0x66   : > { %993 = vmatpush.bf16.msra.mxu0 %v2028_v4  ;;  %v2196_v4 = vor.u32 %v2577_v1, %v2195_v0  ;;  %1006 = vmatpush.bf16.msra.mxu1 %v2100_v62  ;;  %v2267_v0 = vld [vmem:[%s3763_s3 + $0x1b0] sm:$0xf]  ;;  %v2595_v1 = vld [vmem:[%s3763_s3 + $0x1b4] sm:$0xf0] }
  0x68   : > { %1021 = vmatpush.bf16.msra.mxu2 %v2032_v5  ;;  %v2576_v5 = vld [vmem:[%s3763_s3 + $0x124] sm:$0xf] }
  0x69   : > { %v2200_v7 = vor.u32 %v2576_v5, %v2197_v6  ;;  %v2268_v5 = vor.u32 %v2595_v1, %v2267_v0  ;;  %v2269_v6 = vld [vmem:[%s3763_s3 + $0x1b8] sm:$0xf0] }
  0x6a   : > { %994 = vmatpush.bf16.msra.mxu0 %v2020_v14  ;;  %v2575_v14 = vld [vmem:[%s3763_s3 + $0x114] sm:$0xf0]  ;;  %1007 = vmatpush.bf16.msra.mxu1 %v2092_v11  ;;  %v2272_v9 = vor.u32 %v2594_v3, %v2269_v6  ;;  %v2363_v3 = vld [vmem:[%s3763_s3 + $0x230] sm:$0xf]  ;;  %v2365_v6 = vld [vmem:[%s3763_s3 + $0x238] sm:$0xf0] }
  0x6c   : > { %1022 = vmatpush.bf16.msra.mxu2 %v2024_v15  ;;  %v2096_v15 = vor.u32 %v2558_v10, %v2093_v12  ;;  %v2259_v12 = vld [vmem:[%s3763_s3 + $0x1a0] sm:$0xf] }
  0x6e   : > { %1236 = vmatpush.bf16.msrb.mxu0 %v2236_v16  ;;  %v2188_v16 = vor.u32 %v2575_v14, %v2187_v13  ;;  %1035 = vmatpush.bf16.msra.mxu3 %v2096_v15  ;;  %v2593_v13 = vld [vmem:[%s3763_s3 + $0x1a4] sm:$0xf0]  ;;  %v2592_v14 = vld [vmem:[%s3763_s3 + $0x1a4] sm:$0xf] }
  0x6f   : > { %v2260_v15 = vor.u32 %v2593_v13, %v2259_v12  ;;  %v2355_v13 = vld [vmem:[%s3763_s3 + $0x220] sm:$0xf] }
  0x70   : > { %1264 = vmatpush.bf16.msrb.mxu2 %v2240_v17  ;;  %v2574_v17 = vld [vmem:[%s3763_s3 + $0x114] sm:$0xf] }
  0x71   : > { %v2192_v19 = vor.u32 %v2574_v17, %v2189_v18 }
  0x72   : > { %1237 = vmatpush.bf16.msrb.mxu0 %v2228_v22  ;;  %v2556_v22 = vld [vmem:[%s3763_s3 + $0x84] sm:$0xf] }
  0x73   : > { %v2088_v27 = vor.u32 %v2556_v22, %v2085_v24  ;;  %v2251_v22 = vld [vmem:[%s3763_s3 + $0x190] sm:$0xf]  ;;  %v2590_v24 = vld [vmem:[%s3763_s3 + $0x194] sm:$0xf] }
  0x74   : > { %1265 = vmatpush.bf16.msrb.mxu2 %v2232_v23  ;;  %v2084_v23 = vor.u32 %v2557_v21, %v2083_v20 }
  0x75   : > { %1036 = vmatpush.bf16.msra.mxu3 %v2088_v27 }
  0x76   : > { %1238 = vmatpush.bf16.msrb.mxu0 %v2220_v32  ;;  %1008 = vmatpush.bf16.msra.mxu1 %v2084_v23  ;;  %v2184_v32 = vor.u32 %v2572_v29, %v2181_v30  ;;  %v2591_v23 = vld [vmem:[%s3763_s3 + $0x194] sm:$0xf0]  ;;  %v2618_v30 = vld [vmem:[%s3763_s3 + $0x274] sm:$0xf] }
  0x77   : > { %v2252_v27 = vor.u32 %v2591_v23, %v2251_v22  ;;  %v2619_v29 = vld [vmem:[%s3763_s3 + $0x274] sm:$0xf0]  ;;  %v2400_v40 = vor.u32 %v2618_v30, %v2397_v31 }
  0x78   : > { %1266 = vmatpush.bf16.msrb.mxu2 %v2224_v35  ;;  %v2301_v35 = vld [vmem:[%s3763_s3 + $0x1f8] sm:$0xf0]  ;;  %v2607_v23 = vld [vmem:[%s3763_s3 + $0x214] sm:$0xf0] }
  0x79   : > { %v2304_v38 = vor.u32 %v2602_v34, %v2301_v35  ;;  %v2243_v35 = vld [vmem:[%s3763_s3 + $0x180] sm:$0xf] }
  0x7a   : > { %1239 = vmatpush.bf16.msrb.mxu0 %v2212_v43  ;;  %1250 = vmatpush.bf16.msrb.mxu1 %v2300_v37  ;;  %v2292_v43 = vor.u32 %v2601_v59, %v2291_v39  ;;  %v2589_v37 = vld [vmem:[%s3763_s3 + $0x184] sm:$0xf0]  ;;  %v2396_v59 = vor.u32 %v2619_v29, %v2395_v26 }
  0x7b   : > { %1278 = vmatpush.bf16.msrb.mxu3 %v2304_v38  ;;  %v2588_v38 = vld [vmem:[%s3763_s3 + $0x184] sm:$0xf]  ;;  %v2244_v60 = vor.u32 %v2589_v37, %v2243_v35  ;;  %v2605_v35 = vld [vmem:[%s3763_s3 + $0x204] sm:$0xf0] }
  0x7c   : > { %1267 = vmatpush.bf16.msrb.mxu2 %v2216_v44  ;;  %v2599_v44 = vld [vmem:[%s3763_s3 + $0x1d4] sm:$0xf0]  ;;  %v2604_v37 = vld [vmem:[%s3763_s3 + $0x204] sm:$0xf] }
  0x7d   : > { %v2284_v46 = vor.u32 %v2599_v44, %v2283_v55  ;;  %v2616_v55 = vld [vmem:[%s3763_s3 + $0x264] sm:$0xf]  ;;  %v2389_v44 = vld [vmem:[%s3763_s3 + $0x268] sm:$0xf0] }
  0x7e   : > { %1240 = vmatpush.bf16.msrb.mxu0 %v2204_v52  ;;  %1251 = vmatpush.bf16.msrb.mxu1 %v2292_v43  ;;  %v2275_v52 = vld [vmem:[%s3763_s3 + $0x1c0] sm:$0xf]  ;;  %v2392_v47 = vor.u32 %v2616_v55, %v2389_v44  ;;  %v2461_v55 = vld [vmem:[%s3763_s3 + $0x2f8] sm:$0xf0] }
  0x7f   : > { %1279 = vmatpush.bf16.msrb.mxu3 %v2296_v2  ;;  %v2617_v2 = vld [vmem:[%s3763_s3 + $0x264] sm:$0xf0] }
  0x80   : > { %1268 = vmatpush.bf16.msrb.mxu2 %v2208_v56  ;;  %v2276_v56 = vor.u32 %v2597_v53, %v2275_v52  ;;  %v326_v52 = vperm.slane %v3416_v36, 1  ;;  %v2373_v36 = vld [vmem:[%s3763_s3 + $0x248] sm:$0xf0] }
  0x82   : > { %1241 = vmatpush.bf16.msrb.mxu0 %v2196_v4  ;;  %1252 = vmatpush.bf16.msrb.mxu1 %v2284_v46  ;;  %v2388_v46 = vor.u32 %v2617_v2, %v2387_v41  ;;  %v2459_v41 = vld [vmem:[%s3763_s3 + $0x2f0] sm:$0xf]  ;;  %v2634_v2 = vld [vmem:[%s3763_s3 + $0x2f4] sm:$0xf] }
  0x83   : > { %1280 = vmatpush.bf16.msrb.mxu3 %v2288_v50  ;;  %v2614_v50 = vld [vmem:[%s3763_s3 + $0x254] sm:$0xf] }
  0x84   : > { %1269 = vmatpush.bf16.msrb.mxu2 %v2200_v7 }
  0x86   : > { %1242 = vmatpush.bf16.msrb.mxu0 %v2188_v16  ;;  %1253 = vmatpush.bf16.msrb.mxu1 %v2276_v56  ;;  %v2261_v16 = vld [vmem:[%s3763_s3 + $0x1a8] sm:$0xf0] }
  0x87   : > { %1281 = vmatpush.bf16.msrb.mxu3 %v2280_v61  ;;  %v2264_v18 = vor.u32 %v2592_v14, %v2261_v16  ;;  %v2612_v61 = vld [vmem:[%s3763_s3 + $0x244] sm:$0xf]  ;;  %v2609_v14 = vld [vmem:[%s3763_s3 + $0x224] sm:$0xf0]  ;;  %v2357_v16 = vld [vmem:[%s3763_s3 + $0x228] sm:$0xf0] }
  0x88   : > { %1270 = vmatpush.bf16.msrb.mxu2 %v2192_v19  ;;  %v2376_v1 = vor.u32 %v2612_v61, %v2373_v36  ;;  %v2631_v61 = vld [vmem:[%s3763_s3 + $0x2d4] sm:$0xf0]  ;;  %v2630_v36 = vld [vmem:[%s3763_s3 + $0x2d4] sm:$0xf] }
  0x8a   : > { %1243 = vmatpush.bf16.msrb.mxu0 %v2180_v28  ;;  %1254 = vmatpush.bf16.msrb.mxu1 %v2268_v5  ;;  %v2253_v28 = vld [vmem:[%s3763_s3 + $0x198] sm:$0xf0]  ;;  %v2610_v5 = vld [vmem:[%s3763_s3 + $0x234] sm:$0xf] }
  0x8b   : > { %1282 = vmatpush.bf16.msrb.mxu3 %v2272_v9  ;;  %v2368_v12 = vor.u32 %v2610_v5, %v2365_v6 }
  0x8c   : > { %1271 = vmatpush.bf16.msrb.mxu2 %v2184_v32  ;;  %v2256_v32 = vor.u32 %v2590_v24, %v2253_v28  ;;  %v2606_v24 = vld [vmem:[%s3763_s3 + $0x214] sm:$0xf] }
  0x8e   : > { %1255 = vmatpush.bf16.msrb.mxu1 %v2260_v15  ;;  %v2608_v15 = vld [vmem:[%s3763_s3 + $0x224] sm:$0xf] }
  0x8f   : > { %1283 = vmatpush.bf16.msrb.mxu3 %v2264_v18 }
  0x92   : > { %1256 = vmatpush.bf16.msrb.mxu1 %v2252_v27 }
  0x93   : > { %1284 = vmatpush.bf16.msrb.mxu3 %v2256_v32  ;;  %v2339_v32 = vld [vmem:[%s3763_s3 + $0x200] sm:$0xf] }
  0x96   : > { %1257 = vmatpush.bf16.msrb.mxu1 %v2244_v60  ;;  %v2340_v60 = vor.u32 %v2605_v35, %v2339_v32 }
  0xaa   : > { %v678_v45 = vpop.f32.mrf.mxu0 }
  0xab   : > { %v679_v48 = vadd.f32 %v678_v45, %v325_v42  ;;  %v692_v49 = vpop.f32.mrf.mxu1 }
  0xad   : > { %v693_v51 = vadd.f32 %v692_v49, %v679_v48  ;;  %v2379_v48 = vld [vmem:[%s3763_s3 + $0x250] sm:$0xf]  ;;  %v2615_v49 = vld [vmem:[%s3763_s3 + $0x254] sm:$0xf0] }
  0xae   : > { %v2380_v54 = vor.u32 %v2615_v49, %v2379_v48  ;;  %v2464_v49 = vor.u32 %v2634_v2, %v2461_v55 }
  0xb2   : > { %v706_v58 = vpop.f32.mrf.mxu2  ;;  %v680_v4 = vpop.f32.mrf.mxu0 }
  0xb3   : > { %v707_v62 = vadd.f32 %v706_v58, %v693_v51  ;;  %v720_v63 = vpop.f32.mrf.mxu3  ;;  %v681_v7 = vadd.f32 %v680_v4, %v325_v42  ;;  %v694_v8 = vpop.f32.mrf.mxu1  ;;  %v2245_v42 = vld [vmem:[%s3763_s3 + $0x188] sm:$0xf0]  ;;  %v2381_v51 = vld [vmem:[%s3763_s3 + $0x258] sm:$0xf0]  ;;  %v2613_v58 = vld [vmem:[%s3763_s3 + $0x244] sm:$0xf0] }
  0xb4   : > { %v2248_v45 = vor.u32 %v2588_v38, %v2245_v42  ;;  %v2384_v56 = vor.u32 %v2614_v50, %v2381_v51  ;;  %v2372_v0 = vor.u32 %v2613_v58, %v2371_v57  ;;  %v2611_v4 = vld [vmem:[%s3763_s3 + $0x234] sm:$0xf0]  ;;  %v2341_v38 = vld [vmem:[%s3763_s3 + $0x208] sm:$0xf0]  ;;  %v2451_v50 = vld [vmem:[%s3763_s3 + $0x2e0] sm:$0xf] }
  0xb5   : > { %v721_v10 = vadd.f32 %v720_v63, %v707_v62  ;;  %v695_v11 = vadd.f32 %v694_v8, %v681_v7  ;;  %v2635_v42 = vld [vmem:[%s3763_s3 + $0x2f4] sm:$0xf0]  ;;  %v2443_v58 = vld [vmem:[%s3763_s3 + $0x2d0] sm:$0xf] }
  0xb6   : > { %1285 = vmatpush.bf16.msrb.mxu3 %v2248_v45  ;;  %v2344_v45 = vor.u32 %v2604_v37, %v2341_v38  ;;  %v2460_v48 = vor.u32 %v2635_v42, %v2459_v41 }
  0xb7   : > { %vm781_vm0 = vcmp.ge.f32.partialorder %v721_v10, 0.0  ;;  %v785_v19 = vmul.f32 0.1, %v721_v10 }
  0xb9   : > { %v3504_v33 = vsel %vm781_vm0, %v721_v10, %v785_v19  ;;  %v2356_v19 = vor.u32 %v2609_v14, %v2355_v13  ;;  %v2419_v13 = vld [vmem:[%s3763_s3 + $0x2a0] sm:$0xf]  ;;  %v2625_v14 = vld [vmem:[%s3763_s3 + $0x2a4] sm:$0xf0] }
  0xba   : > { %v708_v17 = vpop.f32.mrf.mxu2 }
  0xbb   : > { %v709_v20 = vadd.f32 %v708_v17, %v695_v11  ;;  %v722_v21 = vpop.f32.mrf.mxu3  ;;  %v2364_v11 = vor.u32 %v2611_v4, %v2363_v3  ;;  %v2628_v3 = vld [vmem:[%s3763_s3 + $0x2c4] sm:$0xf]  ;;  %v2437_v4 = vld [vmem:[%s3763_s3 + $0x2c8] sm:$0xf0] }
  0xbc   : > { %v2440_v6 = vor.u32 %v2628_v3, %v2437_v4 }
  0xbd   : > { %v723_v25 = vadd.f32 %v722_v21, %v709_v20  ;;  %v2360_v20 = vor.u32 %v2608_v15, %v2357_v16  ;;  %v2347_v21 = vld [vmem:[%s3763_s3 + $0x210] sm:$0xf]  ;;  %v2624_v15 = vld [vmem:[%s3763_s3 + $0x2a4] sm:$0xf]  ;;  %v2421_v16 = vld [vmem:[%s3763_s3 + $0x2a8] sm:$0xf0] }
  0xbe   : > { %v2348_v30 = vor.u32 %v2607_v23, %v2347_v21  ;;  %v2622_v21 = vld [vmem:[%s3763_s3 + $0x294] sm:$0xf] }
  0xbf   : > { %vm783_vm1 = vcmp.ge.f32.partialorder %v723_v25, 0.0  ;;  %v787_v34 = vmul.f32 0.1, %v723_v25 }
  0xc1   : > { %v3515_v39 = vsel %vm783_vm1, %v723_v25, %v787_v34  ;;  %v2349_v25 = vld [vmem:[%s3763_s3 + $0x218] sm:$0xf0] }
  0xc2   : > { %v3525_v43 = vpack.c.bf16 %v3515_v39, %v3504_v33  ;;  %v2352_v31 = vor.u32 %v2606_v24, %v2349_v25  ;;  %v2403_v25 = vld [vmem:[%s3763_s3 + $0x280] sm:$0xf] }
  0xc4   : > { %995 = vmatmul.bf16.vlgmr.msra.gmra.mxu0 %v3525_v43  ;;  %1023 = vmatmul.bf16.vlgmr.msra.gmra.mxu2 %v3525_v43 }
  0xc5   : > { %1485 = vmatpush.bf16.msra.mxu0 %v2396_v59  ;;  %1513 = vmatpush.bf16.msra.mxu2 %v2400_v40 }
  0xc9   : > { %1486 = vmatpush.bf16.msra.mxu0 %v2388_v46  ;;  %1514 = vmatpush.bf16.msra.mxu2 %v2392_v47 }
  0xca   : > { %v734_v53 = vpop.f32.mrf.mxu0 }
  0xcb   : > { %v735_v62 = vadd.f32 %v734_v53, %v326_v52  ;;  %v748_v63 = vpop.f32.mrf.mxu1  ;;  %v2632_v53 = vld [vmem:[%s3763_s3 + $0x2e4] sm:$0xf] }
  0xcd   : > { %1487 = vmatpush.bf16.msra.mxu0 %v2380_v54  ;;  %1515 = vmatpush.bf16.msra.mxu2 %v2384_v56  ;;  %v749_v7 = vadd.f32 %v748_v63, %v735_v62  ;;  %v2453_v54 = vld [vmem:[%s3763_s3 + $0x2e8] sm:$0xf0]  ;;  %v2445_v62 = vld [vmem:[%s3763_s3 + $0x2d8] sm:$0xf0]  ;;  %v2444_v63 = vor.u32 %v2631_v61, %v2443_v58 }
  0xce   : > { %v2456_v57 = vor.u32 %v2632_v53, %v2453_v54  ;;  %v1557_v54 = vld [vmem:[%s3764_s4] sm:$0x3] }
  0xd1   : > { %1488 = vmatpush.bf16.msra.mxu0 %v2372_v0  ;;  %1516 = vmatpush.bf16.msra.mxu2 %v2376_v1  ;;  %v2448_v0 = vor.u32 %v2630_v36, %v2445_v62  ;;  %v2629_v1 = vld [vmem:[%s3763_s3 + $0x2c4] sm:$0xf0]  ;;  %v1559_v62 = vperm.slane %v1557_v54, 0 }
  0xd2   : > { %v762_v8 = vpop.f32.mrf.mxu2  ;;  %v736_v10 = vpop.f32.mrf.mxu0 }
  0xd3   : > { %v776_v9 = vpop.f32.mrf.mxu3  ;;  %v763_v17 = vadd.f32 %v762_v8, %v749_v7  ;;  %v737_v18 = vadd.f32 %v736_v10, %v326_v52  ;;  %v750_v22 = vpop.f32.mrf.mxu1  ;;  %v2633_v52 = vld [vmem:[%s3763_s3 + $0x2e4] sm:$0xf0]  ;;  %v2427_v7 = vld [vmem:[%s3763_s3 + $0x2b0] sm:$0xf]  ;;  %v2627_v8 = vld [vmem:[%s3763_s3 + $0x2b4] sm:$0xf0] }
  0xd4   : > { %1244 = vmatmul.bf16.vlgmr.msrb.gmra.mxu0 %v3525_v43  ;;  %1272 = vmatmul.bf16.vlgmr.msrb.gmra.mxu2 %v3525_v43  ;;  %v2452_v56 = vor.u32 %v2633_v52, %v2451_v50  ;;  %v2429_v10 = vld [vmem:[%s3763_s3 + $0x2b8] sm:$0xf0] }
  0xd5   : > { %1489 = vmatpush.bf16.msra.mxu0 %v2364_v11  ;;  %1517 = vmatpush.bf16.msra.mxu2 %v2368_v12  ;;  %v777_v26 = vadd.f32 %v776_v9, %v763_v17  ;;  %v751_v27 = vadd.f32 %v750_v22, %v737_v18  ;;  %v2626_v9 = vld [vmem:[%s3763_s3 + $0x2b4] sm:$0xf]  ;;  %v2428_v11 = vor.u32 %v2627_v8, %v2427_v7  ;;  %v2413_v22 = vld [vmem:[%s3763_s3 + $0x298] sm:$0xf0] }
  0xd6   : > { %v2432_v12 = vor.u32 %v2626_v9, %v2429_v10  ;;  %v2420_v17 = vor.u32 %v2625_v14, %v2419_v13  ;;  %v2424_v18 = vor.u32 %v2624_v15, %v2421_v16  ;;  %v2416_v24 = vor.u32 %v2622_v21, %v2413_v22 }
  0xd7   : > { %v786_v59 = vmul.f32 0.1, %v777_v26  ;;  %vm782_vm2 = vcmp.ge.f32.partialorder %v777_v26, 0.0 }
  0xd9   : > { %1490 = vmatpush.bf16.msra.mxu0 %v2356_v19  ;;  %1518 = vmatpush.bf16.msra.mxu2 %v2360_v20  ;;  %v3625_v46 = vsel %vm782_vm2, %v777_v26, %v786_v59  ;;  %v2411_v19 = vld [vmem:[%s3763_s3 + $0x290] sm:$0xf]  ;;  %v2623_v20 = vld [vmem:[%s3763_s3 + $0x294] sm:$0xf0]  ;;  %v2621_v26 = vld [vmem:[%s3763_s3 + $0x284] sm:$0xf0] }
  0xda   : > { %v764_v28 = vpop.f32.mrf.mxu2  ;;  %v2412_v23 = vor.u32 %v2623_v20, %v2411_v19 }
  0xdb   : > { %v765_v29 = vadd.f32 %v764_v28, %v751_v27  ;;  %v778_v34 = vpop.f32.mrf.mxu3  ;;  %v2620_v27 = vld [vmem:[%s3763_s3 + $0x284] sm:$0xf]  ;;  %v2405_v28 = vld [vmem:[%s3763_s3 + $0x288] sm:$0xf0] }
  0xdd   : > { %v779_v40 = vadd.f32 %v778_v34, %v765_v29  ;;  %1491 = vmatpush.bf16.msra.mxu0 %v2348_v30  ;;  %1519 = vmatpush.bf16.msra.mxu2 %v2352_v31  ;;  %v2404_v29 = vor.u32 %v2621_v26, %v2403_v25  ;;  %v2408_v30 = vor.u32 %v2620_v27, %v2405_v28 }
  0xdf   : > { %vm784_vm3 = vcmp.ge.f32.partialorder %v779_v40, 0.0  ;;  %v788_v44 = vmul.f32 0.1, %v779_v40 }
  0xe1   : > { %v3627_v47 = vsel %vm784_vm3, %v779_v40, %v788_v44  ;;  %1492 = vmatpush.bf16.msra.mxu0 %v2340_v60  ;;  %1520 = vmatpush.bf16.msra.mxu2 %v2344_v45 }
  0xe2   : > { %v3634_v51 = vpack.c.bf16 %v3627_v47, %v3625_v46 }
  0xe4   : > { %1009 = vmatmul.bf16.vlgmr.msra.gmra.mxu1 %v3634_v51  ;;  %1037 = vmatmul.bf16.vlgmr.msra.gmra.mxu3 %v3634_v51 }
  0xe5   : > { %1499 = vmatpush.bf16.msra.mxu1 %v2460_v48  ;;  %1527 = vmatpush.bf16.msra.mxu3 %v2464_v49 }
  0xe6   : > { %1493 = vmatmul.bf16.vlgmr.msra.gmra.mxu0 %v3525_v43  ;;  %1521 = vmatmul.bf16.vlgmr.msra.gmra.mxu2 %v3525_v43  ;;  %v2435_v43 = vld [vmem:[%s3763_s3 + $0x2c0] sm:$0xf] }
  0xe7   : > { %v2436_v5 = vor.u32 %v2629_v1, %v2435_v43  ;;  %v1571_v1 = vld [vmem:[%s3765_s5] sm:$0x3] }
  0xe8   : > { %v1573_v14 = vperm.slane %v1571_v1, 0 }
  0xe9   : > { %1500 = vmatpush.bf16.msra.mxu1 %v2452_v56  ;;  %1528 = vmatpush.bf16.msra.mxu3 %v2456_v57 }
  0xed   : > { %1501 = vmatpush.bf16.msra.mxu1 %v2444_v63  ;;  %1529 = vmatpush.bf16.msra.mxu3 %v2448_v0 }
  0xf1   : > { %1502 = vmatpush.bf16.msra.mxu1 %v2436_v5  ;;  %1530 = vmatpush.bf16.msra.mxu3 %v2440_v6 }
  0xf4   : > { %1258 = vmatmul.bf16.vlgmr.msrb.gmra.mxu1 %v3634_v51  ;;  %1286 = vmatmul.bf16.vlgmr.msrb.gmra.mxu3 %v3634_v51 }
  0xf5   : > { %1503 = vmatpush.bf16.msra.mxu1 %v2428_v11  ;;  %1531 = vmatpush.bf16.msra.mxu3 %v2432_v12  ;;  %v1560_v12 = vperm.slane %v1557_v54, 1 }
  0xf9   : > { %1504 = vmatpush.bf16.msra.mxu1 %v2420_v17  ;;  %1532 = vmatpush.bf16.msra.mxu3 %v2424_v18 }
  0xfd   : > { %1505 = vmatpush.bf16.msra.mxu1 %v2412_v23  ;;  %1533 = vmatpush.bf16.msra.mxu3 %v2416_v24 }
 0x101   : > { %1506 = vmatpush.bf16.msra.mxu1 %v2404_v29  ;;  %1534 = vmatpush.bf16.msra.mxu3 %v2408_v30  ;;  %v1574_v30 = vperm.slane %v1571_v1, 1 }
 0x104   : > { %1507 = vmatmul.bf16.vlgmr.msra.gmra.mxu1 %v3634_v51  ;;  %1535 = vmatmul.bf16.vlgmr.msra.gmra.mxu3 %v3634_v51 }
 0x141   : > { %v996_v31 = vpop.f32.mrf.mxu0 }
 0x147   : > { %v1024_v32 = vpop.f32.mrf.mxu2 }
 0x149   : > { %v998_v34 = vpop.f32.mrf.mxu0 }
 0x14f   : > { %v1026_v37 = vpop.f32.mrf.mxu2 }
 0x151   : > { %v1245_v40 = vpop.f32.mrf.mxu0 }
 0x157   : > { %v1273_v42 = vpop.f32.mrf.mxu2 }
 0x159   : > { %v1247_v55 = vpop.f32.mrf.mxu0 }
 0x15f   : > { %v1275_v45 = vpop.f32.mrf.mxu2 }
 0x161   : > { %v1010_v35 = vpop.f32.mrf.mxu1 }
 0x162   : > { %v1011_v56 = vadd.f32 %v1010_v35, %v996_v31 }
 0x163   : > { %v1494_v49 = vpop.f32.mrf.mxu0 }
 0x167   : > { %v1038_v38 = vpop.f32.mrf.mxu3 }
 0x168   : > { %v1039_v3 = vadd.f32 %v1038_v38, %v1024_v32 }
 0x169   : > { %v1012_v59 = vpop.f32.mrf.mxu1  ;;  %v1522_v63 = vpop.f32.mrf.mxu2 }
 0x16a   : > { %v1013_v5 = vadd.f32 %v1012_v59, %v998_v34 }
 0x16b   : > { %v1496_v9 = vpop.f32.mrf.mxu0 }
 0x16f   : > { %v1040_v41 = vpop.f32.mrf.mxu3 }
 0x170   : > { %v1041_v26 = vadd.f32 %v1040_v41, %v1026_v37 }
 0x171   : > { %v1259_v2 = vpop.f32.mrf.mxu1  ;;  %v1524_v27 = vpop.f32.mrf.mxu2 }
 0x172   : > { %v1260_v48 = vadd.f32 %v1259_v2, %v1245_v40 }
 0x174   : > { %v1543_v52 = vrot.slane %v1260_v48, 1 }
 0x176   : > { %v1547_v58 = vadd.f32 %v1543_v52, %v1011_v56 }
 0x177   : > { %v1287_v44 = vpop.f32.mrf.mxu3 }
 0x178   : > { %v1288_v51 = vadd.f32 %v1287_v44, %v1273_v42 }
 0x179   : > { %v1261_v60 = vpop.f32.mrf.mxu1 }
 0x17a   : > { %v1262_v61 = vadd.f32 %v1261_v60, %v1247_v55  ;;  %v1544_v0 = vrot.slane %v1288_v51, 1 }
 0x17c   : > { %v1604_v6 = vrot.slane %v1262_v61, 1  ;;  %v1548_v10 = vadd.f32 %v1544_v0, %v1039_v3 }
 0x17e   : > { %v1608_v18 = vadd.f32 %v1604_v6, %v1013_v5 }
 0x17f   : > { %v1289_v50 = vpop.f32.mrf.mxu3 }
 0x180   : > { %v1290_v11 = vadd.f32 %v1289_v50, %v1275_v45 }
 0x181   : > { %v1508_v53 = vpop.f32.mrf.mxu1 }
 0x182   : > { %v1509_v57 = vadd.f32 %v1508_v53, %v1494_v49  ;;  %v1605_v22 = vrot.slane %v1290_v11, 1 }
 0x184   : > { %v1551_v36 = vrot.slane %v1509_v57, 2  ;;  %v1609_v35 = vadd.f32 %v1605_v22, %v1041_v26  ;;  %v2663_v22 = vmov 0.0  }
 0x186   : > { %v1555_v43 = vadd.f32 %v1551_v36, %v1547_v58 }
 0x187   : > { %v1536_v4 = vpop.f32.mrf.mxu3 }
 0x188   : > { %v1563_v7 = vadd.f32 %v1559_v62, %v1555_v43  ;;  %v1537_v8 = vadd.f32 %v1536_v4, %v1522_v63 }
 0x189   : > { %v1510_v13 = vpop.f32.mrf.mxu1 }
 0x18a   : > { %v1552_v15 = vrot.slane %v1537_v8, 2  ;;  %v1511_v16 = vadd.f32 %v1510_v13, %v1496_v9  ;;  %vm1565_vm4 = vcmp.ge.f32.partialorder %v1563_v7, 0.0  ;;  %v1567_v17 = vmul.f32 0.1, %v1563_v7 }
 0x18c   : > { %v1556_v19 = vadd.f32 %v1552_v15, %v1548_v10  ;;  %v1612_v20 = vrot.slane %v1511_v16, 2  ;;  %v1569_v21 = vsel %vm1565_vm4, %v1563_v7, %v1567_v17 }
 0x18d   : > { %v1577_v23 = vmul.f32 %v1573_v14, %v1569_v21 }
 0x18e   : > { %v1564_v24 = vadd.f32 %v1560_v12, %v1556_v19  ;;  %v1616_v25 = vadd.f32 %v1612_v20, %v1608_v18 }
 0x18f   : > { %v1538_v28 = vpop.f32.mrf.mxu3  ;;  %v1580_v29 = vsel %vm1579_vm5, %v1577_v23, 0.0 }
 0x190   : > { %v1618_v31 = vadd.f32 %v1616_v25, %v1559_v62  ;;  %v1539_v32 = vadd.f32 %v1538_v28, %v1524_v27  ;;  %1581 = vadd.xlane.f32.xlu0 %v1580_v29  ;;  %vm1566_vm6 = vcmp.ge.f32.partialorder %v1564_v24, 0.0  ;;  %v1568_v34 = vmul.f32 0.1, %v1564_v24 }
 0x192   : > { %v1613_v38 = vrot.slane %v1539_v32, 2  ;;  %v1570_v59 = vsel %vm1566_vm6, %v1564_v24, %v1568_v34  ;;  %vm1620_vm7 = vcmp.ge.f32.partialorder %v1618_v31, 0.0  ;;  %v1622_v40 = vmul.f32 0.1, %v1618_v31 }
 0x193   : > { %v1578_v42 = vmul.f32 %v1574_v30, %v1570_v59 }
 0x194   : > { %v1617_v2 = vadd.f32 %v1613_v38, %v1609_v35  ;;  %v1624_v55 = vsel %vm1620_vm7, %v1618_v31, %v1622_v40 }
 0x195   : > { %v1626_v44 = vmul.f32 %v1624_v55, %v1573_v14  ;;  %v1591_v41 = vsel %vm1579_vm5, %v1578_v42, 0.0 }
 0x196   : > { %v1619_v37 = vadd.f32 %v1617_v2, %v1560_v12 }
 0x197   : > { %v1628_v60 = vsel %vm1579_vm5, %v1626_v44, 0.0 }
 0x198   : > { %1592 = vadd.xlane.f32.xlu0 %v1591_v41  ;;  %1629 = vadd.xlane.f32.xlu1 %v1628_v60  ;;  %vm1621_vm8 = vcmp.ge.f32.partialorder %v1619_v37, 0.0  ;;  %v1623_v45 = vmul.f32 0.1, %v1619_v37 }
 0x19a   : > { %v1625_v48 = vsel %vm1621_vm8, %v1619_v37, %v1623_v45 }
 0x19b   : > { %v1627_v49 = vmul.f32 %v1625_v48, %v1574_v30 }
 0x19d   : > { %v1639_v50 = vsel %vm1579_vm5, %v1627_v49, 0.0 }
 0x1a0   : > { %1640 = vadd.xlane.f32.xlu1 %v1639_v50 }
 0x203   : > { %v1582_v52 = vpop.xlane.xlu0 %1581 }
 0x204   : > { %v1583_v51 = vrot.slane %v1582_v52, 4 }
 0x206   : > { %v1584_v53 = vadd.f32 %v1583_v51, %v1582_v52 }
 0x208   : > { %v1585_v54 = vrot.slane %v1584_v53, 2 }
 0x20a   : > { %v1586_v56 = vadd.f32 %v1585_v54, %v1584_v53 }
 0x20b   : > { %v1593_v57 = vpop.xlane.xlu0 %1592  ;;  %v1630_v58 = vpop.xlane.xlu1 %1629 }
 0x20c   : > { %v1594_v61 = vrot.slane %v1593_v57, 4  ;;  %v1631_v36 = vrot.slane %v1630_v58, 4  ;;  %v1587_v62 = vrot.slane %v1586_v56, 1 }
 0x20e   : > { %v1595_v63 = vadd.f32 %v1594_v61, %v1593_v57  ;;  %v1632_v0 = vadd.f32 %v1631_v36, %v1630_v58  ;;  %v1588_v43 = vadd.f32 %v1587_v62, %v1586_v56 }
 0x210   : > { %v1596_v1 = vrot.slane %v1595_v63, 2  ;;  %v1633_v3 = vrot.slane %v1632_v0, 2  ;;  %2636 = vpush %v1588_v43 }
 0x212   : > { %v1597_v4 = vadd.f32 %v1596_v1, %v1595_v63  ;;  %v1634_v5 = vadd.f32 %v1633_v3, %v1632_v0 }
 0x213   : > { %v1641_v6 = vpop.xlane.xlu1 %1640 }
 0x214   : > { %v1642_v7 = vrot.slane %v1641_v6, 4  ;;  %v1598_v8 = vrot.slane %v1597_v4, 1  ;;  %v1635_v9 = vrot.slane %v1634_v5, 1 }
 0x216   : > { %v1643_v10 = vadd.f32 %v1642_v7, %v1641_v6  ;;  %v1599_v11 = vadd.f32 %v1598_v8, %v1597_v4  ;;  %v1636_v12 = vadd.f32 %v1635_v9, %v1634_v5 }
 0x218   : > { %v1644_v13 = vrot.slane %v1643_v10, 2  ;;  %2638 = vpush %v1599_v11 }
 0x219   : > { %2640 = vpush %v1636_v12 }
 0x21a   : > { %v1645_v14 = vadd.f32 %v1644_v13, %v1643_v10 }
 0x21c   : > { %v1646_v15 = vrot.slane %v1645_v14, 1 }
 0x21e   : > { %v1647_v16 = vadd.f32 %v1646_v15, %v1645_v14 }
 0x220   : > { %2642 = vpush %v1647_v16 }
 0x241   : > { %s2637_s12 = spop %2636 }
 0x242   : > { %v1590_v19 = vstv %s2637_s12 }
 0x249   : > { %s2639_s13 = spop %2638 }
 0x24a   : > { %s2641_s14 = spop %2640  ;;  %v1601_v17 = vstv %s2639_s13 }
 0x24b   : > { %v1638_v18 = vstv %s2641_s14  ;;  %vm1650_vm9 = vcmp.ge.f32.partialorder %v1590_v19, %v1601_v17 }
 0x24c   : > { %vm1651_vm10 = vcmp.ge.f32.partialorder %v1590_v19, %v1638_v18  ;;  %vm1656_vm14 = vcmp.ge.f32.partialorder %v1601_v17, %v1638_v18 }
 0x24d   : > { %vm1652_vm11 = vmand %vm1650_vm9, %vm1651_vm10 }
 0x251   : > { %s2643_s15 = spop %2642 }
 0x252   : > { %v1649_v20 = vstv %s2643_s15 }
 0x253   : > { %vm1653_vm12 = vcmp.ge.f32.partialorder %v1590_v19, %v1649_v20  ;;  %vm1658_vm2 = vcmp.ge.f32.partialorder %v1601_v17, %v1649_v20  ;;  %vm1662_vm6 = vcmp.ge.f32.partialorder %v1638_v18, %v1649_v20 }
 0x254   : > { %vm3735_vm13 = vmand %vm1652_vm11, %vm1653_vm12 }
 0x255   : > { %vm1655_vm0 = vmxor %vm3735_vm13, %vm2662_vm15  ;;  %v2465_v23 = vsel %vm3735_vm13, 1.0, %v2663_v22 }
 0x256   : > { %vm1657_vm1 = vmand %vm1655_vm0, %vm1656_vm14  ;;  %v1669_v25 = vmul.f32 %v2465_v23, %v3504_v33 }
 0x257   : > { %vm1659_vm3 = vmand %vm1657_vm1, %vm1658_vm2 }
 0x258   : > { %vm1660_vm4 = vmxor %vm1659_vm3, %vm2662_vm15  ;;  %v2466_v24 = vsel %vm1659_vm3, 1.0, %v2663_v22 }
 0x259   : > { %vm1661_vm5 = vmand %vm1655_vm0, %vm1660_vm4  ;;  %v1672_v26 = vmul.f32 %v2466_v24, %v3625_v46 }
 0x25a   : > { %vm1663_vm7 = vmand %vm1661_vm5, %vm1662_vm6 }
 0x25b   : > { %vm1664_vm8 = vmor %vm3735_vm13, %vm1659_vm3  ;;  %v1673_v27 = vadd.f32 %v1672_v26, %v1669_v25  ;;  %v2467_v28 = vsel %vm1663_vm7, 1.0, %v2663_v22 }
 0x25c   : > { %vm1665_vm9 = vmor %vm1664_vm8, %vm1663_vm7  ;;  %v1676_v29 = vmul.f32 %v2467_v28, %v3515_v39 }
 0x25d   : > { %vm1666_vm10 = vmxor %vm1665_vm9, %vm2662_vm15 }
 0x25e   : > { %v1677_v30 = vadd.f32 %v1676_v29, %v1673_v27  ;;  %v2468_v31 = vsel %vm1666_vm10, 1.0, %v2663_v22 }
 0x25f   : > { %v1680_v32 = vmul.f32 %v2468_v31, %v3627_v47 }
 0x261   : > { %v1681_v33 = vadd.f32 %v1680_v32, %v1677_v30 }
 0x263   : > { %1682 = vst [vmem:[%s254_s20] sm:$0xff] %v1681_v33 }
 0x264 PF: > { %s16_s21 = sadd.s32 1, %s2660_s21  }
 0x265   : > { %p13_p5 = scmp.ge.s32.totalorder %s16_s21, 4  }
 0x267   :  { %15 = sbr.rel (!%p13_p5) target bundleno = 1 (0x1), region = 76 }

</bundles_post_ra>
